<compile_context>
chip_gen: v7x
topology: tpu7x:2x2x1
jax: 0.10.0
libtpu: 0.0.40
codegen_flags: <defaults>
</compile_context>

<pallas_src>
import math

import jax
import jax.numpy as jnp
from jax import lax
from jax.experimental import pallas as pl
from jax.experimental.pallas import tpu as pltpu

# ----- scaled-down config (bert-base-uncased stand-in) -----
B = 2            # batch
S = 8            # sequence length
H = 32           # hidden size      (stands in for 768; MXU under-filled at toy size)
NH = 2           # attention heads
HD = H // NH     # head dim
F = 4 * H        # FFN intermediate (= 128 lanes)
L = 2            # encoder layers   (stands in for 12)
VOCAB = 50
NCAT = 12        # 12 per-category output heads (linear_0 .. linear_11)
NCLS = 3         # classes per head
OUT_PAD = 128    # lane-dense padded output width
LN_EPS = 1e-12


def _layernorm(x, gamma, beta):
    mu = jnp.mean(x, axis=-1, keepdims=True)
    var = jnp.mean((x - mu) ** 2, axis=-1, keepdims=True)
    return (x - mu) * lax.rsqrt(var + LN_EPS) * gamma + beta


def _gelu(x):
    c = math.sqrt(2.0 / math.pi)
    return 0.5 * x * (1.0 + jnp.tanh(c * (x + 0.044715 * x * x * x)))


# -------------------- fully fused forward kernel (L layers + head, one grid step) ----
def fused_kernel(wid_ref, cat_ref,                               # scalar prefetch (SMEM)
                 x0_ref, wqkv_ref, wo_ref, w1_ref, w2_ref, vec_ref,
                 cw_ref, cb_ref, catw_ref, catb_ref,
                 out_ref):
    scale = 1.0 / math.sqrt(HD)
    x = x0_ref[...]                                              # (B*S, H) f32

    # ---------------- L encoder layers, statically unrolled ----------------
    for layer in range(L):
        wqkv = wqkv_ref[layer]                                   # (H, 3H) bf16
        wo = wo_ref[layer]                                       # (H, H)  bf16
        w1 = w1_ref[layer]                                       # (H, F)  bf16
        w2 = w2_ref[layer]                                       # (F, H)  bf16
        vec = vec_ref[layer]                                     # (8, F)  f32 vector slab

        # every vector on its own sublane row, starting at lane 0
        b_f1 = vec[0:1, :]                                       # (1, F)
        b_qkv = vec[1:2, 0:3 * H]                                # (1, 3H)
        b_o = vec[2:3, 0:H]                                      # (1, H)
        g1 = vec[3:4, 0:H]
        be1 = vec[4:5, 0:H]
        g2 = vec[5:6, 0:H]
        be2 = vec[6:7, 0:H]
        b_f2 = vec[7:8, 0:H]

        x16 = x.astype(jnp.bfloat16)

        # fused QKV projection over the whole batch: (B*S, H) @ (H, 3H)
        qkv = jnp.dot(x16, wqkv, preferred_element_type=jnp.float32) + b_qkv

        # attention: per-head scores/softmax/PV (batched over B via einsum),
        # contexts gathered head-contiguous in lanes, then ONE K=H Wo matmul.
        ctxs = []
        for h in range(NH):
            qh = qkv[:, h * HD:(h + 1) * HD].reshape(B, S, HD).astype(jnp.bfloat16)
            kh = qkv[:, H + h * HD:H + (h + 1) * HD].reshape(B, S, HD).astype(jnp.bfloat16)
            vh = qkv[:, 2 * H + h * HD:2 * H + (h + 1) * HD].reshape(B, S, HD).astype(jnp.bfloat16)
            s = jnp.einsum('bqd,bkd->bqk', qh, kh,
                           preferred_element_type=jnp.float32) * scale      # (B, S, S)
            s = s - jnp.max(s, axis=-1, keepdims=True)
            p = jnp.exp(s)
            p = p * pl.reciprocal(jnp.sum(p, axis=-1, keepdims=True), approx=True)
            ctx = jnp.einsum('bqk,bkd->bqd', p.astype(jnp.bfloat16), vh,
                             preferred_element_type=jnp.float32)            # (B, S, HD)
            ctxs.append(ctx.reshape(B * S, HD))
        ctx_all = jnp.concatenate(ctxs, axis=-1)                 # (B*S, H)
        attn = jnp.dot(ctx_all.astype(jnp.bfloat16), wo,
                       preferred_element_type=jnp.float32) + b_o

        # add & LN, GELU-FFN, add & LN (f32 elementwise, bf16 MXU operands)
        x1 = _layernorm(x + attn, g1, be1)
        h1 = jnp.dot(x1.astype(jnp.bfloat16), w1, preferred_element_type=jnp.float32) + b_f1
        h1 = _gelu(h1)
        ffn = jnp.dot(h1.astype(jnp.bfloat16), w2, preferred_element_type=jnp.float32) + b_f2
        x = _layernorm(x1 + ffn, g2, be2)

    # ---------------- classifier head ----------------
    x3 = x.reshape(B, S, H)
    cls = x3[:, 0:1, :].reshape(B, H)                            # CLS token per example

    # masked mean over the word span, vectorized over the batch (iotas hoisted)
    pos = lax.broadcasted_iota(jnp.int32, (B, S, H), 1)          # position within example
    ex = lax.broadcasted_iota(jnp.int32, (B, S, H), 0)           # example index
    start_f = jnp.zeros((B, S, H), jnp.int32)
    end_f = jnp.zeros((B, S, H), jnp.int32)
    for kk in range(B):                                          # B=2 scalar selects
        start_f = jnp.where(ex == kk, wid_ref[kk, 0], start_f)
        end_f = jnp.where(ex == kk, wid_ref[kk, 1], end_f)
    mask = (pos >= start_f) & (pos < end_f)

    msum = jnp.sum(jnp.where(mask, x3, 0.0), axis=1)             # (B, H)
    cnt = jnp.sum(jnp.where(mask[:, :, 0:1], 1.0, 0.0), axis=1)  # (B, 1)
    mean_feat = msum / jnp.maximum(cnt, 1.0)                     # guard empty span

    # concat([mean, cls]) @ W_common == mean @ W[:H] + cls @ W[H:], batched over B
    cw = cw_ref[...]                                             # (2H, H) bf16
    hcom = (jnp.dot(mean_feat.astype(jnp.bfloat16), cw[0:H, :],
                    preferred_element_type=jnp.float32)
            + jnp.dot(cls.astype(jnp.bfloat16), cw[H:2 * H, :],
                      preferred_element_type=jnp.float32)
            + cb_ref[...])
    hcom = jnp.maximum(hcom, 0.0)                                # relu, (B, H) f32

    # per-category linear_{categories[k]}: cat_w VMEM-resident, dynamic first-axis
    # index selection, rows written directly to the padded (8, OUT_PAD) block.
    out_ref[...] = jnp.zeros((8, OUT_PAD), jnp.float32)
    for kk in range(B):                                          # static unroll, B=2
        c = cat_ref[kk]
        row = (jnp.dot(hcom[kk:kk + 1, :].astype(jnp.bfloat16), catw_ref[c],
                       preferred_element_type=jnp.float32) + catb_ref[c])
        out_ref[kk:kk + 1, :] = row


# -------------------- parameter init (deterministic, synthetic) --------------------
def init_params(key):
    def nrm(k, shape, scale=0.02):
        return scale * jax.random.normal(k, shape, dtype=jnp.float32)

    keys = iter(jax.random.split(key, 16))
    p = {}
    p["tok_emb"] = nrm(next(keys), (VOCAB, H))
    p["pos_emb"] = nrm(next(keys), (S, H))
    p["emb_ln_g"] = jnp.ones((1, H), jnp.float32)
    p["emb_ln_b"] = jnp.zeros((1, H), jnp.float32)

    # layer-stacked, packed encoder weights; MXU operands stored as bf16.
    p["wqkv"] = nrm(next(keys), (L, H, 3 * H)).astype(jnp.bfloat16)   # [Wq|Wk|Wv]
    p["wo"] = nrm(next(keys), (L, H, H)).astype(jnp.bfloat16)
    p["w1"] = nrm(next(keys), (L, H, F)).astype(jnp.bfloat16)
    p["w2"] = nrm(next(keys), (L, F, H)).astype(jnp.bfloat16)

    # one (8, F) f32 slab per layer; every vector on its own row at lane 0:
    #   row 0: b_ffn1 | row 1: [bq|bk|bv] | row 2: b_o | row 3: g1 | row 4: be1
    #   row 5: g2     | row 6: be2        | row 7: b_ffn2
    vecs = jnp.zeros((L, 8, F), jnp.float32)
    vecs = vecs.at[:, 3, 0:H].set(1.0)            # ln1 gamma
    vecs = vecs.at[:, 5, 0:H].set(1.0)            # ln2 gamma
    p["vecs"] = vecs

    p["common_w"] = nrm(next(keys), (2 * H, H)).astype(jnp.bfloat16)  # nn.Linear(2*768, 768)
    p["common_b"] = jnp.zeros((1, H), jnp.float32)

    catw = jnp.zeros((NCAT, H, OUT_PAD), jnp.float32)                 # linear_0 .. linear_11
    catw = catw.at[:, :, :NCLS].set(nrm(next(keys), (NCAT, H, NCLS)))
    p["cat_w"] = catw.astype(jnp.bfloat16)
    p["cat_b"] = jnp.zeros((NCAT, 1, OUT_PAD), jnp.float32)
    return p


# -------------------- full forward --------------------
def bert_classifier_forward(params, token_ids, words_id, categories):
    # embedding gather + embedding layernorm (glue, plain JAX)
    x = params["tok_emb"][token_ids] + params["pos_emb"][None, :, :]     # (B, S, H)
    mu = jnp.mean(x, axis=-1, keepdims=True)
    var = jnp.mean((x - mu) ** 2, axis=-1, keepdims=True)
    x = (x - mu) * lax.rsqrt(var + LN_EPS) * params["emb_ln_g"] + params["emb_ln_b"]
    x0 = x.reshape(B * S, H).astype(jnp.float32)                         # batch folded into rows

    # advisory cost estimate for XLA's scheduler
    flops_layer = (2 * B * S * H * 3 * H        # QKV
                   + 2 * B * S * S * H          # QK^T (all heads)
                   + 2 * B * S * S * H          # PV   (all heads)
                   + 2 * B * S * H * H          # Wo
                   + 2 * B * S * H * F          # FFN up
                   + 2 * B * S * F * H)         # FFN down
    flops = L * flops_layer + 2 * B * 2 * H * H + 2 * B * H * OUT_PAD
    transcendentals = L * (B * NH * S * S + B * S * F + 2 * B * S + B * NH * S)
    bytes_accessed = (B * S * H * 4
                      + L * (H * 3 * H + H * H + H * F + F * H) * 2
                      + L * 8 * F * 4
                      + 2 * H * H * 2 + H * 4
                      + NCAT * H * OUT_PAD * 2 + NCAT * OUT_PAD * 4
                      + 8 * OUT_PAD * 4 + B * 2 * 4 + B * 4)

    grid_spec = pltpu.PrefetchScalarGridSpec(
        num_scalar_prefetch=2,                     # words_id, categories -> SMEM
        grid=(1,),                                 # single step: layers unrolled in-kernel
        in_specs=[
            pl.BlockSpec((B * S, H), lambda i, wid, cat: (0, 0)),            # x0
            pl.BlockSpec((L, H, 3 * H), lambda i, wid, cat: (0, 0, 0)),      # wqkv (all layers)
            pl.BlockSpec((L, H, H), lambda i, wid, cat: (0, 0, 0)),          # wo
            pl.BlockSpec((L, H, F), lambda i, wid, cat: (0, 0, 0)),          # w1
            pl.BlockSpec((L, F, H), lambda i, wid, cat: (0, 0, 0)),          # w2
            pl.BlockSpec((L, 8, F), lambda i, wid, cat: (0, 0, 0)),          # bias/LN slabs
            pl.BlockSpec((2 * H, H), lambda i, wid, cat: (0, 0)),            # common_w
            pl.BlockSpec((1, H), lambda i, wid, cat: (0, 0)),                # common_b
            pl.BlockSpec((NCAT, H, OUT_PAD), lambda i, wid, cat: (0, 0, 0)),  # all cat_w
            pl.BlockSpec((NCAT, 1, OUT_PAD), lambda i, wid, cat: (0, 0, 0)),  # all cat_b
        ],
        out_specs=pl.BlockSpec((8, OUT_PAD), lambda i, wid, cat: (0, 0)),    # 8-row unmasked store
    )
    out = pl.pallas_call(
        fused_kernel,
        out_shape=jax.ShapeDtypeStruct((8, OUT_PAD), jnp.float32),
        grid_spec=grid_spec,
        compiler_params=pltpu.CompilerParams(dimension_semantics=("arbitrary",)),
        cost_estimate=pl.CostEstimate(flops=flops, transcendentals=transcendentals,
                                      bytes_accessed=bytes_accessed),
    )(words_id, categories, x0,
      params["wqkv"], params["wo"], params["w1"], params["w2"], params["vecs"],
      params["common_w"], params["common_b"], params["cat_w"], params["cat_b"])
    return out[:B, :NCLS]                                                  # (B, 3)


if __name__ == "__main__":
    key = jax.random.PRNGKey(0)
    kp, kt = jax.random.split(key)
    params = init_params(kp)

    # data['data'], data['words_id'], data['categories']
    token_ids = jax.random.randint(kt, (B, S), 0, VOCAB, dtype=jnp.int32)
    words_id = jnp.array([[1, 5], [2, 7]], dtype=jnp.int32)      # [start, end) per example
    categories = jnp.array([3, 10], dtype=jnp.int32)             # selects linear_3 / linear_10

    fwd = jax.jit(bert_classifier_forward)
    out = fwd(params, token_ids, words_id, categories)
    out = jax.block_until_ready(out)
    assert out.shape == (B, NCLS), out.shape
    print("KERNEL_OK")
</pallas_src>

<mosaic_0001>
module attributes {stable_mosaic.version = 11 : i64} {
  func.func @fused_kernel(%arg0: i32, %arg1: memref<2x2xi32, #tpu.memory_space<smem>>, %arg2: memref<2xi32, #tpu.memory_space<smem>>, %arg3: memref<16x32xf32, #tpu.memory_space<vmem>>, %arg4: memref<2x32x96xbf16, #tpu.memory_space<vmem>>, %arg5: memref<2x32x32xbf16, #tpu.memory_space<vmem>>, %arg6: memref<2x32x128xbf16, #tpu.memory_space<vmem>>, %arg7: memref<2x128x32xbf16, #tpu.memory_space<vmem>>, %arg8: memref<2x8x128xf32, #tpu.memory_space<vmem>>, %arg9: memref<64x32xbf16, #tpu.memory_space<vmem>>, %arg10: memref<1x32xf32, #tpu.memory_space<vmem>>, %arg11: memref<12x32x128xbf16, #tpu.memory_space<vmem>>, %arg12: memref<12x1x128xf32, #tpu.memory_space<vmem>>, %arg13: memref<8x128xf32, #tpu.memory_space<vmem>>) attributes {dimension_semantics = [#tpu.dimension_semantics<arbitrary>], iteration_bounds = array<i64: 1>, scalar_prefetch = 2 : i64, scratch_operands = 0 : i64, tpu.core_type = #tpu.core_type<tc>, window_params = [{pipeline_mode = #tpu.pipeline_mode<synchronous>, transform_indices = @transform_0, window_bounds = array<i64: 16, 32>}, {pipeline_mode = #tpu.pipeline_mode<synchronous>, transform_indices = @transform_1, window_bounds = array<i64: 2, 32, 96>}, {pipeline_mode = #tpu.pipeline_mode<synchronous>, transform_indices = @transform_2, window_bounds = array<i64: 2, 32, 32>}, {pipeline_mode = #tpu.pipeline_mode<synchronous>, transform_indices = @transform_3, window_bounds = array<i64: 2, 32, 128>}, {pipeline_mode = #tpu.pipeline_mode<synchronous>, transform_indices = @transform_4, window_bounds = array<i64: 2, 128, 32>}, {pipeline_mode = #tpu.pipeline_mode<synchronous>, transform_indices = @transform_5, window_bounds = array<i64: 2, 8, 128>}, {pipeline_mode = #tpu.pipeline_mode<synchronous>, transform_indices = @transform_6, window_bounds = array<i64: 64, 32>}, {pipeline_mode = #tpu.pipeline_mode<synchronous>, transform_indices = @transform_7, window_bounds = array<i64: 1, 32>}, {pipeline_mode = #tpu.pipeline_mode<synchronous>, transform_indices = @transform_8, window_bounds = array<i64: 12, 32, 128>}, {pipeline_mode = #tpu.pipeline_mode<synchronous>, transform_indices = @transform_9, window_bounds = array<i64: 12, 1, 128>}, {pipeline_mode = #tpu.pipeline_mode<synchronous>, transform_indices = @transform_10, window_bounds = array<i64: 8, 128>}]} {
    %c0 = arith.constant 0 : index
    %c0_0 = arith.constant 0 : index
    %0 = vector.load %arg3[%c0, %c0_0] : memref<16x32xf32, #tpu.memory_space<vmem>>, vector<16x32xf32>
    %c0_1 = arith.constant 0 : index
    %c0_2 = arith.constant 0 : index
    %c0_3 = arith.constant 0 : index
    %1 = vector.load %arg4[%c0_1, %c0_2, %c0_3] : memref<2x32x96xbf16, #tpu.memory_space<vmem>>, vector<1x32x96xbf16>
    %2 = vector.shape_cast %1 : vector<1x32x96xbf16> to vector<32x96xbf16>
    %c0_4 = arith.constant 0 : index
    %c0_5 = arith.constant 0 : index
    %c0_6 = arith.constant 0 : index
    %3 = vector.load %arg5[%c0_4, %c0_5, %c0_6] : memref<2x32x32xbf16, #tpu.memory_space<vmem>>, vector<1x32x32xbf16>
    %4 = vector.shape_cast %3 : vector<1x32x32xbf16> to vector<32x32xbf16>
    %c0_7 = arith.constant 0 : index
    %c0_8 = arith.constant 0 : index
    %c0_9 = arith.constant 0 : index
    %5 = vector.load %arg6[%c0_7, %c0_8, %c0_9] : memref<2x32x128xbf16, #tpu.memory_space<vmem>>, vector<1x32x128xbf16>
    %6 = vector.shape_cast %5 : vector<1x32x128xbf16> to vector<32x128xbf16>
    %c0_10 = arith.constant 0 : index
    %c0_11 = arith.constant 0 : index
    %c0_12 = arith.constant 0 : index
    %7 = vector.load %arg7[%c0_10, %c0_11, %c0_12] : memref<2x128x32xbf16, #tpu.memory_space<vmem>>, vector<1x128x32xbf16>
    %8 = vector.shape_cast %7 : vector<1x128x32xbf16> to vector<128x32xbf16>
    %c0_13 = arith.constant 0 : index
    %c0_14 = arith.constant 0 : index
    %c0_15 = arith.constant 0 : index
    %9 = vector.load %arg8[%c0_13, %c0_14, %c0_15] : memref<2x8x128xf32, #tpu.memory_space<vmem>>, vector<1x8x128xf32>
    %10 = vector.shape_cast %9 : vector<1x8x128xf32> to vector<8x128xf32>
    %11 = vector.extract_strided_slice %10 {offsets = [0, 0], sizes = [1, 128], strides = [1, 1]} : vector<8x128xf32> to vector<1x128xf32>
    %12 = vector.extract_strided_slice %10 {offsets = [1, 0], sizes = [1, 96], strides = [1, 1]} : vector<8x128xf32> to vector<1x96xf32>
    %13 = vector.extract_strided_slice %10 {offsets = [2, 0], sizes = [1, 32], strides = [1, 1]} : vector<8x128xf32> to vector<1x32xf32>
    %14 = vector.extract_strided_slice %10 {offsets = [3, 0], sizes = [1, 32], strides = [1, 1]} : vector<8x128xf32> to vector<1x32xf32>
    %15 = vector.extract_strided_slice %10 {offsets = [4, 0], sizes = [1, 32], strides = [1, 1]} : vector<8x128xf32> to vector<1x32xf32>
    %16 = vector.extract_strided_slice %10 {offsets = [5, 0], sizes = [1, 32], strides = [1, 1]} : vector<8x128xf32> to vector<1x32xf32>
    %17 = vector.extract_strided_slice %10 {offsets = [6, 0], sizes = [1, 32], strides = [1, 1]} : vector<8x128xf32> to vector<1x32xf32>
    %18 = vector.extract_strided_slice %10 {offsets = [7, 0], sizes = [1, 32], strides = [1, 1]} : vector<8x128xf32> to vector<1x32xf32>
    %19 = arith.truncf %0 : vector<16x32xf32> to vector<16x32xbf16>
    %cst = arith.constant dense<0.000000e+00> : vector<16x96xf32>
    %20 = tpu.matmul %19, %2, %cst {dimension_numbers = #tpu.dot_dimension_numbers<[1], [0], [0], [1], [0, 0, 1, 1], [], []>} : vector<16x32xbf16>, vector<32x96xbf16>, vector<16x96xf32> -> vector<16x96xf32>
    %21 = vector.broadcast %12 : vector<1x96xf32> to vector<16x96xf32>
    %22 = arith.addf %20, %21 : vector<16x96xf32>
    %23 = vector.extract_strided_slice %22 {offsets = [0, 0], sizes = [16, 16], strides = [1, 1]} : vector<16x96xf32> to vector<16x16xf32>
    %24 = vector.shape_cast %23 : vector<16x16xf32> to vector<2x8x16xf32>
    %25 = arith.truncf %24 : vector<2x8x16xf32> to vector<2x8x16xbf16>
    %26 = vector.extract_strided_slice %22 {offsets = [0, 32], sizes = [16, 16], strides = [1, 1]} : vector<16x96xf32> to vector<16x16xf32>
    %27 = vector.shape_cast %26 : vector<16x16xf32> to vector<2x8x16xf32>
    %28 = arith.truncf %27 : vector<2x8x16xf32> to vector<2x8x16xbf16>
    %29 = vector.extract_strided_slice %22 {offsets = [0, 64], sizes = [16, 16], strides = [1, 1]} : vector<16x96xf32> to vector<16x16xf32>
    %30 = vector.shape_cast %29 : vector<16x16xf32> to vector<2x8x16xf32>
    %31 = arith.truncf %30 : vector<2x8x16xf32> to vector<2x8x16xbf16>
    "tpu.trace_start"() <{level = 10 : i32, message = "bqd,bkd->bqk"}> : () -> ()
    %cst_16 = arith.constant dense<0.000000e+00> : vector<2x8x8xf32>
    %32 = tpu.matmul %25, %28, %cst_16 {dimension_numbers = #tpu.dot_dimension_numbers<[2], [2], [1], [1], [0, 0, 0, 1, 1, 1], [0], [0]>} : vector<2x8x16xbf16>, vector<2x8x16xbf16>, vector<2x8x8xf32> -> vector<2x8x8xf32>
    "tpu.trace_stop"() : () -> ()
    %cst_17 = arith.constant 2.500000e-01 : f32
    %33 = vector.broadcast %cst_17 : f32 to vector<2x8x8xf32>
    %34 = arith.mulf %32, %33 : vector<2x8x8xf32>
    %cst_18 = arith.constant dense<0xFF800000> : vector<2x8xf32>
    %35 = vector.multi_reduction <maximumf>, %34, %cst_18 [2] : vector<2x8x8xf32> to vector<2x8xf32>
    %36 = vector.shape_cast %35 : vector<2x8xf32> to vector<2x8x1xf32>
    %37 = vector.broadcast %36 : vector<2x8x1xf32> to vector<2x8x8xf32>
    %38 = arith.subf %34, %37 : vector<2x8x8xf32>
    %39 = math.exp %38 : vector<2x8x8xf32>
    %cst_19 = arith.constant dense<0.000000e+00> : vector<2x8xf32>
    %40 = vector.multi_reduction <add>, %39, %cst_19 [2] : vector<2x8x8xf32> to vector<2x8xf32>
    %41 = vector.shape_cast %40 : vector<2x8xf32> to vector<2x8x1xf32>
    %42 = tpu.reciprocal %41 {approx = true} : vector<2x8x1xf32> -> vector<2x8x1xf32>
    %43 = vector.broadcast %42 : vector<2x8x1xf32> to vector<2x8x8xf32>
    %44 = arith.mulf %39, %43 : vector<2x8x8xf32>
    %45 = arith.truncf %44 : vector<2x8x8xf32> to vector<2x8x8xbf16>
    "tpu.trace_start"() <{level = 10 : i32, message = "bqk,bkd->bqd"}> : () -> ()
    %cst_20 = arith.constant dense<0.000000e+00> : vector<2x8x16xf32>
    %46 = tpu.matmul %45, %31, %cst_20 {dimension_numbers = #tpu.dot_dimension_numbers<[2], [1], [1], [2], [0, 0, 0, 1, 1, 2], [0], [0]>} : vector<2x8x8xbf16>, vector<2x8x16xbf16>, vector<2x8x16xf32> -> vector<2x8x16xf32>
    "tpu.trace_stop"() : () -> ()
    %47 = vector.shape_cast %46 : vector<2x8x16xf32> to vector<16x16xf32>
    %48 = vector.extract_strided_slice %22 {offsets = [0, 16], sizes = [16, 16], strides = [1, 1]} : vector<16x96xf32> to vector<16x16xf32>
    %49 = vector.shape_cast %48 : vector<16x16xf32> to vector<2x8x16xf32>
    %50 = arith.truncf %49 : vector<2x8x16xf32> to vector<2x8x16xbf16>
    %51 = vector.extract_strided_slice %22 {offsets = [0, 48], sizes = [16, 16], strides = [1, 1]} : vector<16x96xf32> to vector<16x16xf32>
    %52 = vector.shape_cast %51 : vector<16x16xf32> to vector<2x8x16xf32>
    %53 = arith.truncf %52 : vector<2x8x16xf32> to vector<2x8x16xbf16>
    %54 = vector.extract_strided_slice %22 {offsets = [0, 80], sizes = [16, 16], strides = [1, 1]} : vector<16x96xf32> to vector<16x16xf32>
    %55 = vector.shape_cast %54 : vector<16x16xf32> to vector<2x8x16xf32>
    %56 = arith.truncf %55 : vector<2x8x16xf32> to vector<2x8x16xbf16>
    "tpu.trace_start"() <{level = 10 : i32, message = "bqd,bkd->bqk"}> : () -> ()
    %cst_21 = arith.constant dense<0.000000e+00> : vector<2x8x8xf32>
    %57 = tpu.matmul %50, %53, %cst_21 {dimension_numbers = #tpu.dot_dimension_numbers<[2], [2], [1], [1], [0, 0, 0, 1, 1, 1], [0], [0]>} : vector<2x8x16xbf16>, vector<2x8x16xbf16>, vector<2x8x8xf32> -> vector<2x8x8xf32>
    "tpu.trace_stop"() : () -> ()
    %cst_22 = arith.constant 2.500000e-01 : f32
    %58 = vector.broadcast %cst_22 : f32 to vector<2x8x8xf32>
    %59 = arith.mulf %57, %58 : vector<2x8x8xf32>
    %cst_23 = arith.constant dense<0xFF800000> : vector<2x8xf32>
    %60 = vector.multi_reduction <maximumf>, %59, %cst_23 [2] : vector<2x8x8xf32> to vector<2x8xf32>
    %61 = vector.shape_cast %60 : vector<2x8xf32> to vector<2x8x1xf32>
    %62 = vector.broadcast %61 : vector<2x8x1xf32> to vector<2x8x8xf32>
    %63 = arith.subf %59, %62 : vector<2x8x8xf32>
    %64 = math.exp %63 : vector<2x8x8xf32>
    %cst_24 = arith.constant dense<0.000000e+00> : vector<2x8xf32>
    %65 = vector.multi_reduction <add>, %64, %cst_24 [2] : vector<2x8x8xf32> to vector<2x8xf32>
    %66 = vector.shape_cast %65 : vector<2x8xf32> to vector<2x8x1xf32>
    %67 = tpu.reciprocal %66 {approx = true} : vector<2x8x1xf32> -> vector<2x8x1xf32>
    %68 = vector.broadcast %67 : vector<2x8x1xf32> to vector<2x8x8xf32>
    %69 = arith.mulf %64, %68 : vector<2x8x8xf32>
    %70 = arith.truncf %69 : vector<2x8x8xf32> to vector<2x8x8xbf16>
    "tpu.trace_start"() <{level = 10 : i32, message = "bqk,bkd->bqd"}> : () -> ()
    %cst_25 = arith.constant dense<0.000000e+00> : vector<2x8x16xf32>
    %71 = tpu.matmul %70, %56, %cst_25 {dimension_numbers = #tpu.dot_dimension_numbers<[2], [1], [1], [2], [0, 0, 0, 1, 1, 2], [0], [0]>} : vector<2x8x8xbf16>, vector<2x8x16xbf16>, vector<2x8x16xf32> -> vector<2x8x16xf32>
    "tpu.trace_stop"() : () -> ()
    %72 = vector.shape_cast %71 : vector<2x8x16xf32> to vector<16x16xf32>
    %73 = tpu.concatenate %47, %72 in 1 : vector<16x16xf32>, vector<16x16xf32> -> vector<16x32xf32>
    %74 = arith.truncf %73 : vector<16x32xf32> to vector<16x32xbf16>
    %cst_26 = arith.constant dense<0.000000e+00> : vector<16x32xf32>
    %75 = tpu.matmul %74, %4, %cst_26 {dimension_numbers = #tpu.dot_dimension_numbers<[1], [0], [0], [1], [0, 0, 1, 1], [], []>} : vector<16x32xbf16>, vector<32x32xbf16>, vector<16x32xf32> -> vector<16x32xf32>
    %76 = vector.broadcast %13 : vector<1x32xf32> to vector<16x32xf32>
    %77 = arith.addf %75, %76 : vector<16x32xf32>
    %78 = arith.addf %0, %77 : vector<16x32xf32>
    %cst_27 = arith.constant dense<0.000000e+00> : vector<16xf32>
    %79 = vector.multi_reduction <add>, %78, %cst_27 [1] : vector<16x32xf32> to vector<16xf32>
    %80 = vector.shape_cast %79 : vector<16xf32> to vector<16x1xf32>
    %cst_28 = arith.constant 3.200000e+01 : f32
    %81 = vector.broadcast %cst_28 : f32 to vector<16x1xf32>
    %82 = arith.divf %80, %81 : vector<16x1xf32>
    %83 = vector.broadcast %82 : vector<16x1xf32> to vector<16x32xf32>
    %84 = arith.subf %78, %83 : vector<16x32xf32>
    %85 = arith.mulf %84, %84 : vector<16x32xf32>
    %cst_29 = arith.constant dense<0.000000e+00> : vector<16xf32>
    %86 = vector.multi_reduction <add>, %85, %cst_29 [1] : vector<16x32xf32> to vector<16xf32>
    %87 = vector.shape_cast %86 : vector<16xf32> to vector<16x1xf32>
    %cst_30 = arith.constant 3.200000e+01 : f32
    %88 = vector.broadcast %cst_30 : f32 to vector<16x1xf32>
    %89 = arith.divf %87, %88 : vector<16x1xf32>
    %90 = vector.broadcast %82 : vector<16x1xf32> to vector<16x32xf32>
    %91 = arith.subf %78, %90 : vector<16x32xf32>
    %cst_31 = arith.constant 9.99999996E-13 : f32
    %92 = vector.broadcast %cst_31 : f32 to vector<16x1xf32>
    %93 = arith.addf %89, %92 : vector<16x1xf32>
    %94 = math.rsqrt %93 : vector<16x1xf32>
    %95 = vector.broadcast %94 : vector<16x1xf32> to vector<16x32xf32>
    %96 = arith.mulf %91, %95 : vector<16x32xf32>
    %97 = vector.broadcast %14 : vector<1x32xf32> to vector<16x32xf32>
    %98 = arith.mulf %96, %97 : vector<16x32xf32>
    %99 = vector.broadcast %15 : vector<1x32xf32> to vector<16x32xf32>
    %100 = arith.addf %98, %99 : vector<16x32xf32>
    %101 = arith.truncf %100 : vector<16x32xf32> to vector<16x32xbf16>
    %cst_32 = arith.constant dense<0.000000e+00> : vector<16x128xf32>
    %102 = tpu.matmul %101, %6, %cst_32 {dimension_numbers = #tpu.dot_dimension_numbers<[1], [0], [0], [1], [0, 0, 1, 1], [], []>} : vector<16x32xbf16>, vector<32x128xbf16>, vector<16x128xf32> -> vector<16x128xf32>
    %103 = vector.broadcast %11 : vector<1x128xf32> to vector<16x128xf32>
    %104 = arith.addf %102, %103 : vector<16x128xf32>
    %cst_33 = arith.constant 5.000000e-01 : f32
    %105 = vector.broadcast %cst_33 : f32 to vector<16x128xf32>
    %106 = arith.mulf %105, %104 : vector<16x128xf32>
    %cst_34 = arith.constant 4.471500e-02 : f32
    %107 = vector.broadcast %cst_34 : f32 to vector<16x128xf32>
    %108 = arith.mulf %107, %104 : vector<16x128xf32>
    %109 = arith.mulf %108, %104 : vector<16x128xf32>
    %110 = arith.mulf %109, %104 : vector<16x128xf32>
    %111 = arith.addf %104, %110 : vector<16x128xf32>
    %cst_35 = arith.constant 0.797884583 : f32
    %112 = vector.broadcast %cst_35 : f32 to vector<16x128xf32>
    %113 = arith.mulf %112, %111 : vector<16x128xf32>
    %114 = math.tanh %113 : vector<16x128xf32>
    %cst_36 = arith.constant 1.000000e+00 : f32
    %115 = vector.broadcast %cst_36 : f32 to vector<16x128xf32>
    %116 = arith.addf %115, %114 : vector<16x128xf32>
    %117 = arith.mulf %106, %116 : vector<16x128xf32>
    %118 = arith.truncf %117 : vector<16x128xf32> to vector<16x128xbf16>
    %cst_37 = arith.constant dense<0.000000e+00> : vector<16x32xf32>
    %119 = tpu.matmul %118, %8, %cst_37 {dimension_numbers = #tpu.dot_dimension_numbers<[1], [0], [0], [1], [0, 0, 1, 1], [], []>} : vector<16x128xbf16>, vector<128x32xbf16>, vector<16x32xf32> -> vector<16x32xf32>
    %120 = vector.broadcast %18 : vector<1x32xf32> to vector<16x32xf32>
    %121 = arith.addf %119, %120 : vector<16x32xf32>
    %122 = arith.addf %100, %121 : vector<16x32xf32>
    %cst_38 = arith.constant dense<0.000000e+00> : vector<16xf32>
    %123 = vector.multi_reduction <add>, %122, %cst_38 [1] : vector<16x32xf32> to vector<16xf32>
    %124 = vector.shape_cast %123 : vector<16xf32> to vector<16x1xf32>
    %cst_39 = arith.constant 3.200000e+01 : f32
    %125 = vector.broadcast %cst_39 : f32 to vector<16x1xf32>
    %126 = arith.divf %124, %125 : vector<16x1xf32>
    %127 = vector.broadcast %126 : vector<16x1xf32> to vector<16x32xf32>
    %128 = arith.subf %122, %127 : vector<16x32xf32>
    %129 = arith.mulf %128, %128 : vector<16x32xf32>
    %cst_40 = arith.constant dense<0.000000e+00> : vector<16xf32>
    %130 = vector.multi_reduction <add>, %129, %cst_40 [1] : vector<16x32xf32> to vector<16xf32>
    %131 = vector.shape_cast %130 : vector<16xf32> to vector<16x1xf32>
    %cst_41 = arith.constant 3.200000e+01 : f32
    %132 = vector.broadcast %cst_41 : f32 to vector<16x1xf32>
    %133 = arith.divf %131, %132 : vector<16x1xf32>
    %134 = vector.broadcast %126 : vector<16x1xf32> to vector<16x32xf32>
    %135 = arith.subf %122, %134 : vector<16x32xf32>
    %cst_42 = arith.constant 9.99999996E-13 : f32
    %136 = vector.broadcast %cst_42 : f32 to vector<16x1xf32>
    %137 = arith.addf %133, %136 : vector<16x1xf32>
    %138 = math.rsqrt %137 : vector<16x1xf32>
    %139 = vector.broadcast %138 : vector<16x1xf32> to vector<16x32xf32>
    %140 = arith.mulf %135, %139 : vector<16x32xf32>
    %141 = vector.broadcast %16 : vector<1x32xf32> to vector<16x32xf32>
    %142 = arith.mulf %140, %141 : vector<16x32xf32>
    %143 = vector.broadcast %17 : vector<1x32xf32> to vector<16x32xf32>
    %144 = arith.addf %142, %143 : vector<16x32xf32>
    %c1 = arith.constant 1 : index
    %c0_43 = arith.constant 0 : index
    %c0_44 = arith.constant 0 : index
    %145 = vector.load %arg4[%c1, %c0_43, %c0_44] : memref<2x32x96xbf16, #tpu.memory_space<vmem>>, vector<1x32x96xbf16>
    %146 = vector.shape_cast %145 : vector<1x32x96xbf16> to vector<32x96xbf16>
    %c1_45 = arith.constant 1 : index
    %c0_46 = arith.constant 0 : index
    %c0_47 = arith.constant 0 : index
    %147 = vector.load %arg5[%c1_45, %c0_46, %c0_47] : memref<2x32x32xbf16, #tpu.memory_space<vmem>>, vector<1x32x32xbf16>
    %148 = vector.shape_cast %147 : vector<1x32x32xbf16> to vector<32x32xbf16>
    %c1_48 = arith.constant 1 : index
    %c0_49 = arith.constant 0 : index
    %c0_50 = arith.constant 0 : index
    %149 = vector.load %arg6[%c1_48, %c0_49, %c0_50] : memref<2x32x128xbf16, #tpu.memory_space<vmem>>, vector<1x32x128xbf16>
    %150 = vector.shape_cast %149 : vector<1x32x128xbf16> to vector<32x128xbf16>
    %c1_51 = arith.constant 1 : index
    %c0_52 = arith.constant 0 : index
    %c0_53 = arith.constant 0 : index
    %151 = vector.load %arg7[%c1_51, %c0_52, %c0_53] : memref<2x128x32xbf16, #tpu.memory_space<vmem>>, vector<1x128x32xbf16>
    %152 = vector.shape_cast %151 : vector<1x128x32xbf16> to vector<128x32xbf16>
    %c1_54 = arith.constant 1 : index
    %c0_55 = arith.constant 0 : index
    %c0_56 = arith.constant 0 : index
    %153 = vector.load %arg8[%c1_54, %c0_55, %c0_56] : memref<2x8x128xf32, #tpu.memory_space<vmem>>, vector<1x8x128xf32>
    %154 = vector.shape_cast %153 : vector<1x8x128xf32> to vector<8x128xf32>
    %155 = vector.extract_strided_slice %154 {offsets = [0, 0], sizes = [1, 128], strides = [1, 1]} : vector<8x128xf32> to vector<1x128xf32>
    %156 = vector.extract_strided_slice %154 {offsets = [1, 0], sizes = [1, 96], strides = [1, 1]} : vector<8x128xf32> to vector<1x96xf32>
    %157 = vector.extract_strided_slice %154 {offsets = [2, 0], sizes = [1, 32], strides = [1, 1]} : vector<8x128xf32> to vector<1x32xf32>
    %158 = vector.extract_strided_slice %154 {offsets = [3, 0], sizes = [1, 32], strides = [1, 1]} : vector<8x128xf32> to vector<1x32xf32>
    %159 = vector.extract_strided_slice %154 {offsets = [4, 0], sizes = [1, 32], strides = [1, 1]} : vector<8x128xf32> to vector<1x32xf32>
    %160 = vector.extract_strided_slice %154 {offsets = [5, 0], sizes = [1, 32], strides = [1, 1]} : vector<8x128xf32> to vector<1x32xf32>
    %161 = vector.extract_strided_slice %154 {offsets = [6, 0], sizes = [1, 32], strides = [1, 1]} : vector<8x128xf32> to vector<1x32xf32>
    %162 = vector.extract_strided_slice %154 {offsets = [7, 0], sizes = [1, 32], strides = [1, 1]} : vector<8x128xf32> to vector<1x32xf32>
    %163 = arith.truncf %144 : vector<16x32xf32> to vector<16x32xbf16>
    %cst_57 = arith.constant dense<0.000000e+00> : vector<16x96xf32>
    %164 = tpu.matmul %163, %146, %cst_57 {dimension_numbers = #tpu.dot_dimension_numbers<[1], [0], [0], [1], [0, 0, 1, 1], [], []>} : vector<16x32xbf16>, vector<32x96xbf16>, vector<16x96xf32> -> vector<16x96xf32>
    %165 = vector.broadcast %156 : vector<1x96xf32> to vector<16x96xf32>
    %166 = arith.addf %164, %165 : vector<16x96xf32>
    %167 = vector.extract_strided_slice %166 {offsets = [0, 0], sizes = [16, 16], strides = [1, 1]} : vector<16x96xf32> to vector<16x16xf32>
    %168 = vector.shape_cast %167 : vector<16x16xf32> to vector<2x8x16xf32>
    %169 = arith.truncf %168 : vector<2x8x16xf32> to vector<2x8x16xbf16>
    %170 = vector.extract_strided_slice %166 {offsets = [0, 32], sizes = [16, 16], strides = [1, 1]} : vector<16x96xf32> to vector<16x16xf32>
    %171 = vector.shape_cast %170 : vector<16x16xf32> to vector<2x8x16xf32>
    %172 = arith.truncf %171 : vector<2x8x16xf32> to vector<2x8x16xbf16>
    %173 = vector.extract_strided_slice %166 {offsets = [0, 64], sizes = [16, 16], strides = [1, 1]} : vector<16x96xf32> to vector<16x16xf32>
    %174 = vector.shape_cast %173 : vector<16x16xf32> to vector<2x8x16xf32>
    %175 = arith.truncf %174 : vector<2x8x16xf32> to vector<2x8x16xbf16>
    "tpu.trace_start"() <{level = 10 : i32, message = "bqd,bkd->bqk"}> : () -> ()
    %cst_58 = arith.constant dense<0.000000e+00> : vector<2x8x8xf32>
    %176 = tpu.matmul %169, %172, %cst_58 {dimension_numbers = #tpu.dot_dimension_numbers<[2], [2], [1], [1], [0, 0, 0, 1, 1, 1], [0], [0]>} : vector<2x8x16xbf16>, vector<2x8x16xbf16>, vector<2x8x8xf32> -> vector<2x8x8xf32>
    "tpu.trace_stop"() : () -> ()
    %cst_59 = arith.constant 2.500000e-01 : f32
    %177 = vector.broadcast %cst_59 : f32 to vector<2x8x8xf32>
    %178 = arith.mulf %176, %177 : vector<2x8x8xf32>
    %cst_60 = arith.constant dense<0xFF800000> : vector<2x8xf32>
    %179 = vector.multi_reduction <maximumf>, %178, %cst_60 [2] : vector<2x8x8xf32> to vector<2x8xf32>
    %180 = vector.shape_cast %179 : vector<2x8xf32> to vector<2x8x1xf32>
    %181 = vector.broadcast %180 : vector<2x8x1xf32> to vector<2x8x8xf32>
    %182 = arith.subf %178, %181 : vector<2x8x8xf32>
    %183 = math.exp %182 : vector<2x8x8xf32>
    %cst_61 = arith.constant dense<0.000000e+00> : vector<2x8xf32>
    %184 = vector.multi_reduction <add>, %183, %cst_61 [2] : vector<2x8x8xf32> to vector<2x8xf32>
    %185 = vector.shape_cast %184 : vector<2x8xf32> to vector<2x8x1xf32>
    %186 = tpu.reciprocal %185 {approx = true} : vector<2x8x1xf32> -> vector<2x8x1xf32>
    %187 = vector.broadcast %186 : vector<2x8x1xf32> to vector<2x8x8xf32>
    %188 = arith.mulf %183, %187 : vector<2x8x8xf32>
    %189 = arith.truncf %188 : vector<2x8x8xf32> to vector<2x8x8xbf16>
    "tpu.trace_start"() <{level = 10 : i32, message = "bqk,bkd->bqd"}> : () -> ()
    %cst_62 = arith.constant dense<0.000000e+00> : vector<2x8x16xf32>
    %190 = tpu.matmul %189, %175, %cst_62 {dimension_numbers = #tpu.dot_dimension_numbers<[2], [1], [1], [2], [0, 0, 0, 1, 1, 2], [0], [0]>} : vector<2x8x8xbf16>, vector<2x8x16xbf16>, vector<2x8x16xf32> -> vector<2x8x16xf32>
    "tpu.trace_stop"() : () -> ()
    %191 = vector.shape_cast %190 : vector<2x8x16xf32> to vector<16x16xf32>
    %192 = vector.extract_strided_slice %166 {offsets = [0, 16], sizes = [16, 16], strides = [1, 1]} : vector<16x96xf32> to vector<16x16xf32>
    %193 = vector.shape_cast %192 : vector<16x16xf32> to vector<2x8x16xf32>
    %194 = arith.truncf %193 : vector<2x8x16xf32> to vector<2x8x16xbf16>
    %195 = vector.extract_strided_slice %166 {offsets = [0, 48], sizes = [16, 16], strides = [1, 1]} : vector<16x96xf32> to vector<16x16xf32>
    %196 = vector.shape_cast %195 : vector<16x16xf32> to vector<2x8x16xf32>
    %197 = arith.truncf %196 : vector<2x8x16xf32> to vector<2x8x16xbf16>
    %198 = vector.extract_strided_slice %166 {offsets = [0, 80], sizes = [16, 16], strides = [1, 1]} : vector<16x96xf32> to vector<16x16xf32>
    %199 = vector.shape_cast %198 : vector<16x16xf32> to vector<2x8x16xf32>
    %200 = arith.truncf %199 : vector<2x8x16xf32> to vector<2x8x16xbf16>
    "tpu.trace_start"() <{level = 10 : i32, message = "bqd,bkd->bqk"}> : () -> ()
    %cst_63 = arith.constant dense<0.000000e+00> : vector<2x8x8xf32>
    %201 = tpu.matmul %194, %197, %cst_63 {dimension_numbers = #tpu.dot_dimension_numbers<[2], [2], [1], [1], [0, 0, 0, 1, 1, 1], [0], [0]>} : vector<2x8x16xbf16>, vector<2x8x16xbf16>, vector<2x8x8xf32> -> vector<2x8x8xf32>
    "tpu.trace_stop"() : () -> ()
    %cst_64 = arith.constant 2.500000e-01 : f32
    %202 = vector.broadcast %cst_64 : f32 to vector<2x8x8xf32>
    %203 = arith.mulf %201, %202 : vector<2x8x8xf32>
    %cst_65 = arith.constant dense<0xFF800000> : vector<2x8xf32>
    %204 = vector.multi_reduction <maximumf>, %203, %cst_65 [2] : vector<2x8x8xf32> to vector<2x8xf32>
    %205 = vector.shape_cast %204 : vector<2x8xf32> to vector<2x8x1xf32>
    %206 = vector.broadcast %205 : vector<2x8x1xf32> to vector<2x8x8xf32>
    %207 = arith.subf %203, %206 : vector<2x8x8xf32>
    %208 = math.exp %207 : vector<2x8x8xf32>
    %cst_66 = arith.constant dense<0.000000e+00> : vector<2x8xf32>
    %209 = vector.multi_reduction <add>, %208, %cst_66 [2] : vector<2x8x8xf32> to vector<2x8xf32>
    %210 = vector.shape_cast %209 : vector<2x8xf32> to vector<2x8x1xf32>
    %211 = tpu.reciprocal %210 {approx = true} : vector<2x8x1xf32> -> vector<2x8x1xf32>
    %212 = vector.broadcast %211 : vector<2x8x1xf32> to vector<2x8x8xf32>
    %213 = arith.mulf %208, %212 : vector<2x8x8xf32>
    %214 = arith.truncf %213 : vector<2x8x8xf32> to vector<2x8x8xbf16>
    "tpu.trace_start"() <{level = 10 : i32, message = "bqk,bkd->bqd"}> : () -> ()
    %cst_67 = arith.constant dense<0.000000e+00> : vector<2x8x16xf32>
    %215 = tpu.matmul %214, %200, %cst_67 {dimension_numbers = #tpu.dot_dimension_numbers<[2], [1], [1], [2], [0, 0, 0, 1, 1, 2], [0], [0]>} : vector<2x8x8xbf16>, vector<2x8x16xbf16>, vector<2x8x16xf32> -> vector<2x8x16xf32>
    "tpu.trace_stop"() : () -> ()
    %216 = vector.shape_cast %215 : vector<2x8x16xf32> to vector<16x16xf32>
    %217 = tpu.concatenate %191, %216 in 1 : vector<16x16xf32>, vector<16x16xf32> -> vector<16x32xf32>
    %218 = arith.truncf %217 : vector<16x32xf32> to vector<16x32xbf16>
    %cst_68 = arith.constant dense<0.000000e+00> : vector<16x32xf32>
    %219 = tpu.matmul %218, %148, %cst_68 {dimension_numbers = #tpu.dot_dimension_numbers<[1], [0], [0], [1], [0, 0, 1, 1], [], []>} : vector<16x32xbf16>, vector<32x32xbf16>, vector<16x32xf32> -> vector<16x32xf32>
    %220 = vector.broadcast %157 : vector<1x32xf32> to vector<16x32xf32>
    %221 = arith.addf %219, %220 : vector<16x32xf32>
    %222 = arith.addf %144, %221 : vector<16x32xf32>
    %cst_69 = arith.constant dense<0.000000e+00> : vector<16xf32>
    %223 = vector.multi_reduction <add>, %222, %cst_69 [1] : vector<16x32xf32> to vector<16xf32>
    %224 = vector.shape_cast %223 : vector<16xf32> to vector<16x1xf32>
    %cst_70 = arith.constant 3.200000e+01 : f32
    %225 = vector.broadcast %cst_70 : f32 to vector<16x1xf32>
    %226 = arith.divf %224, %225 : vector<16x1xf32>
    %227 = vector.broadcast %226 : vector<16x1xf32> to vector<16x32xf32>
    %228 = arith.subf %222, %227 : vector<16x32xf32>
    %229 = arith.mulf %228, %228 : vector<16x32xf32>
    %cst_71 = arith.constant dense<0.000000e+00> : vector<16xf32>
    %230 = vector.multi_reduction <add>, %229, %cst_71 [1] : vector<16x32xf32> to vector<16xf32>
    %231 = vector.shape_cast %230 : vector<16xf32> to vector<16x1xf32>
    %cst_72 = arith.constant 3.200000e+01 : f32
    %232 = vector.broadcast %cst_72 : f32 to vector<16x1xf32>
    %233 = arith.divf %231, %232 : vector<16x1xf32>
    %234 = vector.broadcast %226 : vector<16x1xf32> to vector<16x32xf32>
    %235 = arith.subf %222, %234 : vector<16x32xf32>
    %cst_73 = arith.constant 9.99999996E-13 : f32
    %236 = vector.broadcast %cst_73 : f32 to vector<16x1xf32>
    %237 = arith.addf %233, %236 : vector<16x1xf32>
    %238 = math.rsqrt %237 : vector<16x1xf32>
    %239 = vector.broadcast %238 : vector<16x1xf32> to vector<16x32xf32>
    %240 = arith.mulf %235, %239 : vector<16x32xf32>
    %241 = vector.broadcast %158 : vector<1x32xf32> to vector<16x32xf32>
    %242 = arith.mulf %240, %241 : vector<16x32xf32>
    %243 = vector.broadcast %159 : vector<1x32xf32> to vector<16x32xf32>
    %244 = arith.addf %242, %243 : vector<16x32xf32>
    %245 = arith.truncf %244 : vector<16x32xf32> to vector<16x32xbf16>
    %cst_74 = arith.constant dense<0.000000e+00> : vector<16x128xf32>
    %246 = tpu.matmul %245, %150, %cst_74 {dimension_numbers = #tpu.dot_dimension_numbers<[1], [0], [0], [1], [0, 0, 1, 1], [], []>} : vector<16x32xbf16>, vector<32x128xbf16>, vector<16x128xf32> -> vector<16x128xf32>
    %247 = vector.broadcast %155 : vector<1x128xf32> to vector<16x128xf32>
    %248 = arith.addf %246, %247 : vector<16x128xf32>
    %cst_75 = arith.constant 5.000000e-01 : f32
    %249 = vector.broadcast %cst_75 : f32 to vector<16x128xf32>
    %250 = arith.mulf %249, %248 : vector<16x128xf32>
    %cst_76 = arith.constant 4.471500e-02 : f32
    %251 = vector.broadcast %cst_76 : f32 to vector<16x128xf32>
    %252 = arith.mulf %251, %248 : vector<16x128xf32>
    %253 = arith.mulf %252, %248 : vector<16x128xf32>
    %254 = arith.mulf %253, %248 : vector<16x128xf32>
    %255 = arith.addf %248, %254 : vector<16x128xf32>
    %cst_77 = arith.constant 0.797884583 : f32
    %256 = vector.broadcast %cst_77 : f32 to vector<16x128xf32>
    %257 = arith.mulf %256, %255 : vector<16x128xf32>
    %258 = math.tanh %257 : vector<16x128xf32>
    %cst_78 = arith.constant 1.000000e+00 : f32
    %259 = vector.broadcast %cst_78 : f32 to vector<16x128xf32>
    %260 = arith.addf %259, %258 : vector<16x128xf32>
    %261 = arith.mulf %250, %260 : vector<16x128xf32>
    %262 = arith.truncf %261 : vector<16x128xf32> to vector<16x128xbf16>
    %cst_79 = arith.constant dense<0.000000e+00> : vector<16x32xf32>
    %263 = tpu.matmul %262, %152, %cst_79 {dimension_numbers = #tpu.dot_dimension_numbers<[1], [0], [0], [1], [0, 0, 1, 1], [], []>} : vector<16x128xbf16>, vector<128x32xbf16>, vector<16x32xf32> -> vector<16x32xf32>
    %264 = vector.broadcast %162 : vector<1x32xf32> to vector<16x32xf32>
    %265 = arith.addf %263, %264 : vector<16x32xf32>
    %266 = arith.addf %244, %265 : vector<16x32xf32>
    %cst_80 = arith.constant dense<0.000000e+00> : vector<16xf32>
    %267 = vector.multi_reduction <add>, %266, %cst_80 [1] : vector<16x32xf32> to vector<16xf32>
    %268 = vector.shape_cast %267 : vector<16xf32> to vector<16x1xf32>
    %cst_81 = arith.constant 3.200000e+01 : f32
    %269 = vector.broadcast %cst_81 : f32 to vector<16x1xf32>
    %270 = arith.divf %268, %269 : vector<16x1xf32>
    %271 = vector.broadcast %270 : vector<16x1xf32> to vector<16x32xf32>
    %272 = arith.subf %266, %271 : vector<16x32xf32>
    %273 = arith.mulf %272, %272 : vector<16x32xf32>
    %cst_82 = arith.constant dense<0.000000e+00> : vector<16xf32>
    %274 = vector.multi_reduction <add>, %273, %cst_82 [1] : vector<16x32xf32> to vector<16xf32>
    %275 = vector.shape_cast %274 : vector<16xf32> to vector<16x1xf32>
    %cst_83 = arith.constant 3.200000e+01 : f32
    %276 = vector.broadcast %cst_83 : f32 to vector<16x1xf32>
    %277 = arith.divf %275, %276 : vector<16x1xf32>
    %278 = vector.broadcast %270 : vector<16x1xf32> to vector<16x32xf32>
    %279 = arith.subf %266, %278 : vector<16x32xf32>
    %cst_84 = arith.constant 9.99999996E-13 : f32
    %280 = vector.broadcast %cst_84 : f32 to vector<16x1xf32>
    %281 = arith.addf %277, %280 : vector<16x1xf32>
    %282 = math.rsqrt %281 : vector<16x1xf32>
    %283 = vector.broadcast %282 : vector<16x1xf32> to vector<16x32xf32>
    %284 = arith.mulf %279, %283 : vector<16x32xf32>
    %285 = vector.broadcast %160 : vector<1x32xf32> to vector<16x32xf32>
    %286 = arith.mulf %284, %285 : vector<16x32xf32>
    %287 = vector.broadcast %161 : vector<1x32xf32> to vector<16x32xf32>
    %288 = arith.addf %286, %287 : vector<16x32xf32>
    %289 = vector.shape_cast %288 : vector<16x32xf32> to vector<2x8x32xf32>
    %290 = vector.extract_strided_slice %289 {offsets = [0, 0, 0], sizes = [2, 1, 32], strides = [1, 1, 1]} : vector<2x8x32xf32> to vector<2x1x32xf32>
    %291 = vector.shape_cast %290 : vector<2x1x32xf32> to vector<2x32xf32>
    %292 = tpu.iota {dimensions = array<i32: 1>} : vector<2x8x32xi32>
    %293 = tpu.iota {dimensions = array<i32: 0>} : vector<2x8x32xi32>
    %c0_i32 = arith.constant 0 : i32
    %294 = vector.broadcast %c0_i32 : i32 to vector<2x8x32xi32>
    %c0_i32_85 = arith.constant 0 : i32
    %295 = vector.broadcast %c0_i32_85 : i32 to vector<2x8x32xi32>
    %c0_i32_86 = arith.constant 0 : i32
    %296 = vector.broadcast %c0_i32_86 : i32 to vector<2x8x32xi32>
    %297 = arith.cmpi eq, %293, %296 : vector<2x8x32xi32>
    %c0_87 = arith.constant 0 : index
    %c0_88 = arith.constant 0 : index
    %298 = memref.load %arg1[%c0_87, %c0_88] : memref<2x2xi32, #tpu.memory_space<smem>>
    %299 = vector.broadcast %298 : i32 to vector<2x8x32xi32>
    %300 = arith.select %297, %299, %294 : vector<2x8x32xi1>, vector<2x8x32xi32>
    %c0_i32_89 = arith.constant 0 : i32
    %301 = vector.broadcast %c0_i32_89 : i32 to vector<2x8x32xi32>
    %302 = arith.cmpi eq, %293, %301 : vector<2x8x32xi32>
    %c0_90 = arith.constant 0 : index
    %c1_91 = arith.constant 1 : index
    %303 = memref.load %arg1[%c0_90, %c1_91] : memref<2x2xi32, #tpu.memory_space<smem>>
    %304 = vector.broadcast %303 : i32 to vector<2x8x32xi32>
    %305 = arith.select %302, %304, %295 : vector<2x8x32xi1>, vector<2x8x32xi32>
    %c1_i32 = arith.constant 1 : i32
    %306 = vector.broadcast %c1_i32 : i32 to vector<2x8x32xi32>
    %307 = arith.cmpi eq, %293, %306 : vector<2x8x32xi32>
    %c1_92 = arith.constant 1 : index
    %c0_93 = arith.constant 0 : index
    %308 = memref.load %arg1[%c1_92, %c0_93] : memref<2x2xi32, #tpu.memory_space<smem>>
    %309 = vector.broadcast %308 : i32 to vector<2x8x32xi32>
    %310 = arith.select %307, %309, %300 : vector<2x8x32xi1>, vector<2x8x32xi32>
    %c1_i32_94 = arith.constant 1 : i32
    %311 = vector.broadcast %c1_i32_94 : i32 to vector<2x8x32xi32>
    %312 = arith.cmpi eq, %293, %311 : vector<2x8x32xi32>
    %c1_95 = arith.constant 1 : index
    %c1_96 = arith.constant 1 : index
    %313 = memref.load %arg1[%c1_95, %c1_96] : memref<2x2xi32, #tpu.memory_space<smem>>
    %314 = vector.broadcast %313 : i32 to vector<2x8x32xi32>
    %315 = arith.select %312, %314, %305 : vector<2x8x32xi1>, vector<2x8x32xi32>
    %316 = arith.cmpi sge, %292, %310 : vector<2x8x32xi32>
    %317 = arith.cmpi slt, %292, %315 : vector<2x8x32xi32>
    %318 = arith.andi %316, %317 : vector<2x8x32xi1>
    %cst_97 = arith.constant 0.000000e+00 : f32
    %319 = vector.broadcast %cst_97 : f32 to vector<2x8x32xf32>
    %320 = arith.select %318, %289, %319 : vector<2x8x32xi1>, vector<2x8x32xf32>
    %cst_98 = arith.constant dense<0.000000e+00> : vector<2x32xf32>
    %321 = vector.multi_reduction <add>, %320, %cst_98 [1] : vector<2x8x32xf32> to vector<2x32xf32>
    %322 = vector.extract_strided_slice %318 {offsets = [0, 0, 0], sizes = [2, 8, 1], strides = [1, 1, 1]} : vector<2x8x32xi1> to vector<2x8x1xi1>
    %cst_99 = arith.constant 1.000000e+00 : f32
    %cst_100 = arith.constant 0.000000e+00 : f32
    %323 = vector.broadcast %cst_99 : f32 to vector<2x8x1xf32>
    %324 = vector.broadcast %cst_100 : f32 to vector<2x8x1xf32>
    %325 = arith.select %322, %323, %324 : vector<2x8x1xi1>, vector<2x8x1xf32>
    %cst_101 = arith.constant dense<0.000000e+00> : vector<2x1xf32>
    %326 = vector.multi_reduction <add>, %325, %cst_101 [1] : vector<2x8x1xf32> to vector<2x1xf32>
    %cst_102 = arith.constant 1.000000e+00 : f32
    %327 = vector.broadcast %cst_102 : f32 to vector<2x1xf32>
    %328 = arith.maximumf %326, %327 : vector<2x1xf32>
    %329 = vector.broadcast %328 : vector<2x1xf32> to vector<2x32xf32>
    %330 = arith.divf %321, %329 : vector<2x32xf32>
    %c0_103 = arith.constant 0 : index
    %c0_104 = arith.constant 0 : index
    %331 = vector.load %arg9[%c0_103, %c0_104] : memref<64x32xbf16, #tpu.memory_space<vmem>>, vector<64x32xbf16>
    %332 = arith.truncf %330 : vector<2x32xf32> to vector<2x32xbf16>
    %333 = vector.extract_strided_slice %331 {offsets = [0, 0], sizes = [32, 32], strides = [1, 1]} : vector<64x32xbf16> to vector<32x32xbf16>
    %cst_105 = arith.constant dense<0.000000e+00> : vector<2x32xf32>
    %334 = tpu.matmul %332, %333, %cst_105 {dimension_numbers = #tpu.dot_dimension_numbers<[1], [0], [0], [1], [0, 0, 1, 1], [], []>} : vector<2x32xbf16>, vector<32x32xbf16>, vector<2x32xf32> -> vector<2x32xf32>
    %335 = arith.truncf %291 : vector<2x32xf32> to vector<2x32xbf16>
    %336 = vector.extract_strided_slice %331 {offsets = [32, 0], sizes = [32, 32], strides = [1, 1]} : vector<64x32xbf16> to vector<32x32xbf16>
    %cst_106 = arith.constant dense<0.000000e+00> : vector<2x32xf32>
    %337 = tpu.matmul %335, %336, %cst_106 {dimension_numbers = #tpu.dot_dimension_numbers<[1], [0], [0], [1], [0, 0, 1, 1], [], []>} : vector<2x32xbf16>, vector<32x32xbf16>, vector<2x32xf32> -> vector<2x32xf32>
    %338 = arith.addf %334, %337 : vector<2x32xf32>
    %c0_107 = arith.constant 0 : index
    %c0_108 = arith.constant 0 : index
    %339 = vector.load %arg10[%c0_107, %c0_108] : memref<1x32xf32, #tpu.memory_space<vmem>>, vector<1x32xf32>
    %340 = vector.broadcast %339 : vector<1x32xf32> to vector<2x32xf32>
    %341 = arith.addf %338, %340 : vector<2x32xf32>
    %cst_109 = arith.constant 0.000000e+00 : f32
    %342 = vector.broadcast %cst_109 : f32 to vector<2x32xf32>
    %343 = arith.maximumf %341, %342 : vector<2x32xf32>
    %cst_110 = arith.constant 0.000000e+00 : f32
    %344 = vector.broadcast %cst_110 : f32 to vector<8x128xf32>
    %c0_111 = arith.constant 0 : index
    %c0_112 = arith.constant 0 : index
    %345 = vector.load %arg13[%c0_111, %c0_112] : memref<8x128xf32, #tpu.memory_space<vmem>>, vector<8x128xf32>
    tpu.vector_store %arg13[%c0_111, %c0_112], %344 {strides = array<i32>} : memref<8x128xf32, #tpu.memory_space<vmem>>, vector<8x128xf32>,
    %c0_113 = arith.constant 0 : index
    %346 = memref.load %arg2[%c0_113] : memref<2xi32, #tpu.memory_space<smem>>
    %347 = vector.extract_strided_slice %343 {offsets = [0, 0], sizes = [1, 32], strides = [1, 1]} : vector<2x32xf32> to vector<1x32xf32>
    %348 = arith.truncf %347 : vector<1x32xf32> to vector<1x32xbf16>
    %349 = arith.index_cast %346 : i32 to index
    %c0_114 = arith.constant 0 : index
    %c0_115 = arith.constant 0 : index
    %350 = vector.load %arg11[%349, %c0_114, %c0_115] : memref<12x32x128xbf16, #tpu.memory_space<vmem>>, vector<1x32x128xbf16>
    %351 = vector.shape_cast %350 : vector<1x32x128xbf16> to vector<32x128xbf16>
    %cst_116 = arith.constant dense<0.000000e+00> : vector<1x128xf32>
    %352 = tpu.matmul %348, %351, %cst_116 {dimension_numbers = #tpu.dot_dimension_numbers<[1], [0], [0], [1], [0, 0, 1, 1], [], []>} : vector<1x32xbf16>, vector<32x128xbf16>, vector<1x128xf32> -> vector<1x128xf32>
    %353 = arith.index_cast %346 : i32 to index
    %c0_117 = arith.constant 0 : index
    %c0_118 = arith.constant 0 : index
    %354 = vector.load %arg12[%353, %c0_117, %c0_118] : memref<12x1x128xf32, #tpu.memory_space<vmem>>, vector<1x1x128xf32>
    %355 = vector.shape_cast %354 : vector<1x1x128xf32> to vector<1x128xf32>
    %356 = arith.addf %352, %355 : vector<1x128xf32>
    %c0_119 = arith.constant 0 : index
    %c0_120 = arith.constant 0 : index
    %357 = vector.load %arg13[%c0_119, %c0_120] : memref<8x128xf32, #tpu.memory_space<vmem>>, vector<1x128xf32>
    tpu.vector_store %arg13[%c0_119, %c0_120], %356 {strides = array<i32>} : memref<8x128xf32, #tpu.memory_space<vmem>>, vector<1x128xf32>,
    %c1_121 = arith.constant 1 : index
    %358 = memref.load %arg2[%c1_121] : memref<2xi32, #tpu.memory_space<smem>>
    %359 = vector.extract_strided_slice %343 {offsets = [1, 0], sizes = [1, 32], strides = [1, 1]} : vector<2x32xf32> to vector<1x32xf32>
    %360 = arith.truncf %359 : vector<1x32xf32> to vector<1x32xbf16>
    %361 = arith.index_cast %358 : i32 to index
    %c0_122 = arith.constant 0 : index
    %c0_123 = arith.constant 0 : index
    %362 = vector.load %arg11[%361, %c0_122, %c0_123] : memref<12x32x128xbf16, #tpu.memory_space<vmem>>, vector<1x32x128xbf16>
    %363 = vector.shape_cast %362 : vector<1x32x128xbf16> to vector<32x128xbf16>
    %cst_124 = arith.constant dense<0.000000e+00> : vector<1x128xf32>
    %364 = tpu.matmul %360, %363, %cst_124 {dimension_numbers = #tpu.dot_dimension_numbers<[1], [0], [0], [1], [0, 0, 1, 1], [], []>} : vector<1x32xbf16>, vector<32x128xbf16>, vector<1x128xf32> -> vector<1x128xf32>
    %365 = arith.index_cast %358 : i32 to index
    %c0_125 = arith.constant 0 : index
    %c0_126 = arith.constant 0 : index
    %366 = vector.load %arg12[%365, %c0_125, %c0_126] : memref<12x1x128xf32, #tpu.memory_space<vmem>>, vector<1x1x128xf32>
    %367 = vector.shape_cast %366 : vector<1x1x128xf32> to vector<1x128xf32>
    %368 = arith.addf %364, %367 : vector<1x128xf32>
    %c1_127 = arith.constant 1 : index
    %c0_128 = arith.constant 0 : index
    %369 = vector.load %arg13[%c1_127, %c0_128] : memref<8x128xf32, #tpu.memory_space<vmem>>, vector<1x128xf32>
    tpu.vector_store %arg13[%c1_127, %c0_128], %368 {strides = array<i32>} : memref<8x128xf32, #tpu.memory_space<vmem>>, vector<1x128xf32>,
    return
  }
  func.func @transform_0(%arg0: i32, %arg1: memref<2x2xi32, #tpu.memory_space<smem>>, %arg2: memref<2xi32, #tpu.memory_space<smem>>) -> (i32, i32) {
    %c0_i32 = arith.constant 0 : i32
    %c0_i32_0 = arith.constant 0 : i32
    %c0_i32_1 = arith.constant 0 : i32
    return %c0_i32, %c0_i32_0 : i32, i32
  }
  func.func @transform_1(%arg0: i32, %arg1: memref<2x2xi32, #tpu.memory_space<smem>>, %arg2: memref<2xi32, #tpu.memory_space<smem>>) -> (i32, i32, i32) {
    %c0_i32 = arith.constant 0 : i32
    %c0_i32_0 = arith.constant 0 : i32
    %c0_i32_1 = arith.constant 0 : i32
    %c0_i32_2 = arith.constant 0 : i32
    return %c0_i32, %c0_i32_0, %c0_i32_1 : i32, i32, i32
  }
  func.func @transform_2(%arg0: i32, %arg1: memref<2x2xi32, #tpu.memory_space<smem>>, %arg2: memref<2xi32, #tpu.memory_space<smem>>) -> (i32, i32, i32) {
    %c0_i32 = arith.constant 0 : i32
    %c0_i32_0 = arith.constant 0 : i32
    %c0_i32_1 = arith.constant 0 : i32
    %c0_i32_2 = arith.constant 0 : i32
    return %c0_i32, %c0_i32_0, %c0_i32_1 : i32, i32, i32
  }
  func.func @transform_3(%arg0: i32, %arg1: memref<2x2xi32, #tpu.memory_space<smem>>, %arg2: memref<2xi32, #tpu.memory_space<smem>>) -> (i32, i32, i32) {
    %c0_i32 = arith.constant 0 : i32
    %c0_i32_0 = arith.constant 0 : i32
    %c0_i32_1 = arith.constant 0 : i32
    %c0_i32_2 = arith.constant 0 : i32
    return %c0_i32, %c0_i32_0, %c0_i32_1 : i32, i32, i32
  }
  func.func @transform_4(%arg0: i32, %arg1: memref<2x2xi32, #tpu.memory_space<smem>>, %arg2: memref<2xi32, #tpu.memory_space<smem>>) -> (i32, i32, i32) {
    %c0_i32 = arith.constant 0 : i32
    %c0_i32_0 = arith.constant 0 : i32
    %c0_i32_1 = arith.constant 0 : i32
    %c0_i32_2 = arith.constant 0 : i32
    return %c0_i32, %c0_i32_0, %c0_i32_1 : i32, i32, i32
  }
  func.func @transform_5(%arg0: i32, %arg1: memref<2x2xi32, #tpu.memory_space<smem>>, %arg2: memref<2xi32, #tpu.memory_space<smem>>) -> (i32, i32, i32) {
    %c0_i32 = arith.constant 0 : i32
    %c0_i32_0 = arith.constant 0 : i32
    %c0_i32_1 = arith.constant 0 : i32
    %c0_i32_2 = arith.constant 0 : i32
    return %c0_i32, %c0_i32_0, %c0_i32_1 : i32, i32, i32
  }
  func.func @transform_6(%arg0: i32, %arg1: memref<2x2xi32, #tpu.memory_space<smem>>, %arg2: memref<2xi32, #tpu.memory_space<smem>>) -> (i32, i32) {
    %c0_i32 = arith.constant 0 : i32
    %c0_i32_0 = arith.constant 0 : i32
    %c0_i32_1 = arith.constant 0 : i32
    return %c0_i32, %c0_i32_0 : i32, i32
  }
  func.func @transform_7(%arg0: i32, %arg1: memref<2x2xi32, #tpu.memory_space<smem>>, %arg2: memref<2xi32, #tpu.memory_space<smem>>) -> (i32, i32) {
    %c0_i32 = arith.constant 0 : i32
    %c0_i32_0 = arith.constant 0 : i32
    %c0_i32_1 = arith.constant 0 : i32
    return %c0_i32, %c0_i32_0 : i32, i32
  }
  func.func @transform_8(%arg0: i32, %arg1: memref<2x2xi32, #tpu.memory_space<smem>>, %arg2: memref<2xi32, #tpu.memory_space<smem>>) -> (i32, i32, i32) {
    %c0_i32 = arith.constant 0 : i32
    %c0_i32_0 = arith.constant 0 : i32
    %c0_i32_1 = arith.constant 0 : i32
    %c0_i32_2 = arith.constant 0 : i32
    return %c0_i32, %c0_i32_0, %c0_i32_1 : i32, i32, i32
  }
  func.func @transform_9(%arg0: i32, %arg1: memref<2x2xi32, #tpu.memory_space<smem>>, %arg2: memref<2xi32, #tpu.memory_space<smem>>) -> (i32, i32, i32) {
    %c0_i32 = arith.constant 0 : i32
    %c0_i32_0 = arith.constant 0 : i32
    %c0_i32_1 = arith.constant 0 : i32
    %c0_i32_2 = arith.constant 0 : i32
    return %c0_i32, %c0_i32_0, %c0_i32_1 : i32, i32, i32
  }
  func.func @transform_10(%arg0: i32, %arg1: memref<2x2xi32, #tpu.memory_space<smem>>, %arg2: memref<2xi32, #tpu.memory_space<smem>>) -> (i32, i32) {
    %c0_i32 = arith.constant 0 : i32
    %c0_i32_0 = arith.constant 0 : i32
    %c0_i32_1 = arith.constant 0 : i32
    return %c0_i32, %c0_i32_0 : i32, i32
  }
}

</mosaic_0001>

<bundles_post_ra>
// kernel: bert_classifier_forward.1
= control target key start
LH: loop header
LB: loop body
LE: loop exit
PB: predicated region body
PF: predicated region fallthrough
CT: control target
= control target key end

     0   :  { %s3287_s0 = inlined_call_operand.vmem [shape: s32[2,2], index: 0, kind: input, shape index: {}]   ;;  %s3288_s2 = inlined_call_operand.vmem [shape: f32[16,32], index: 2, kind: input, shape index: {}]   ;;  %s3289_s3 = inlined_call_operand.vmem [shape: bf16[2,32,96], index: 3, kind: input, shape index: {}]   ;;  %s3290_s4 = inlined_call_operand.vmem [shape: bf16[2,32,32], index: 4, kind: input, shape index: {}]   ;;  %s3291_s5 = inlined_call_operand.vmem [shape: bf16[2,32,128], index: 5, kind: input, shape index: {}]   ;;  %s3292_s6 = inlined_call_operand.vmem [shape: bf16[2,128,32], index: 6, kind: input, shape index: {}]   ;;  %s3293_s7 = inlined_call_operand.vmem [shape: f32[2,8,128], index: 7, kind: input, shape index: {}]   ;;  %s3294_s8 = inlined_call_operand.vmem [shape: bf16[64,32], index: 8, kind: input, shape index: {}]   ;;  %s3295_s9 = inlined_call_operand.vmem [shape: f32[1,32], index: 9, kind: input, shape index: {}]   ;;  %s3296_s10 = inlined_call_operand.vmem [shape: bf16[12,32,128], index: 10, kind: input, shape index: {}]   ;;  %s3297_s11 = inlined_call_operand.vmem [shape: f32[12,1,128], index: 11, kind: input, shape index: {}]   ;;  %s3298_s12 = inlined_call_operand.vmem [shape: f32[8,128], index: 12, kind: output, shape index: {}]   ;;  %s3299_s1 = inlined_call_operand.vmem [shape: s32[2], index: 1, kind: input, shape index: {}]  }
   0x1   :  { %s17_s23 = sshll.u32 %s3287_s0, 4  ;;  %s21_s26 = sshll.u32 %s3299_s1, 4  ;;  %s18_s23 = int_to_ptr.vmem [resolvable:$true] %s17_s23  ;;  %s22_s26 = int_to_ptr.vmem [resolvable:$true] %s21_s26 }
   0x2   :  { %s2634_s27 = scalar_lea.vmem %s18_s23, 32  ;;  %p2639_p1 = scmp.lt.s32.totalorder %s18_s23, %s18_s23 }
   0x3   :  { %p2635_p0 = scmp.ne.s32.totalorder %s18_s23, %s2634_s27  ;;  %p2640_p2 = scmp.lt.s32.totalorder %s2634_s27, %s2634_s27 }
   0x5   :  { %p2641_p3 = por %p2640_p2, %p2639_p1 }
   0x7   :  { %p2642_p4 = pnand %p2641_p3, %p2635_p0 }
   0x9   :  { %2645 = shalt.err (!%p2642_p4)  }
   0xa   :  { %s2660_s28 = smov [#allocation3]   ;;  %s2646_s29 = scalar_lea.vmem %s22_s26, 16 }
   0xb   :  { %20 = dma.vmem_to_smem %s18_s23, 32, %s2660_s28, [#allocation2] }
   0xc   :  { %p2647_p5 = scmp.ne.s32.totalorder %s22_s26, %s2646_s29  ;;  %p2651_p6 = scmp.lt.s32.totalorder %s22_s26, %s22_s26 }
   0xd   :  { %p2652_p7 = scmp.lt.s32.totalorder %s2646_s29, %s2646_s29 }
   0xf   :  { %p2653_p8 = por %p2652_p7, %p2651_p6 }
  0x11   :  { %p2654_p9 = pnand %p2653_p8, %p2647_p5 }
  0x13   :  { %2657 = shalt.err (!%p2654_p9)  }
  0x14   :  { %s2661_s0 = smov [#allocation4]  }
  0x15   :  { %24 = dma.vmem_to_smem %s22_s26, 16, %s2661_s0, [#allocation2] }
  0x16   :  { %2658 = dma.done.wait [#allocation2], 48 }
  0x17   :  { %2659 = vsyncadd [#allocation2], 4294967248 }
  0x18   :  { %26 = sfence }
  0x19   :  { %v2537_v0 = vld [vmem:[%s3289_s3] sm:$0xff]   ;;  %v2662_v1 = vmov 0.0   ;;  %v2538_v2 = vld [vmem:[%s3289_s3 + $0x8] sm:$0xff]   ;;  %vm2663_vm0 = vmmov 0   ;;  %vm96_vm1 = vcmask 261120   ;;  %v80_v6 = vlaneseq  ;;  %s2664_s22 = smov 96  }
  0x1a   :  { %2301 = vmatprep.subr.bf16.mxu0 %v2662_v1  ;;  %1973 = vst [vmem:[%s3298_s12] sm:$0xff] %v2662_v1  ;;  %2309 = vmatprep.subr.bf16.mxu1 %v2662_v1  ;;  %v2758_v3 = vld [vmem:[%s3288_s2] sm:$0xff]  ;;  %v2763_v4 = vld [vmem:[%s3288_s2 + $0x8] sm:$0xff]  ;;  %vm146_vm2 = vcmask 130048   ;;  %vm244_vm3 = vcmask 64512   ;;  %s2665_s23 = smov 64   ;;  %s2666_s24 = smov 80  }
  0x1b   :  { %2302 = vmatpush3.bf16.msra.mxu0 %v2537_v0  ;;  %2305 = vmatprep.mubr.msk.bf16.mxu0 %vm2663_vm0, %v2662_v1  ;;  %v79_v5 = vpack.c.bf16 %v2763_v4, %v2758_v3  ;;  %v2774_v7 = vshrl.u32 %v80_v6, 7  ;;  %v2780_v9 = vld [vmem:[%s3293_s7] sm:$0xff]  ;;  %vm274_vm4 = vcmask 1043456   ;;  %s2667_s25 = smov 112   ;;  %s2668_s26 = smov 48   ;;  %vm1845_vm11 = vcmask 1041409  }
  0x1c   :  { %2303 = vmatprep.subr.bf16.mxu0 %v2662_v1  ;;  %2311 = vmatprep.mubr.msk.bf16.mxu1 %vm2663_vm0, %v2662_v1  ;;  %s2669_s1 = smov 16   ;;  %s3257_s14 = sld [smem:[#allocation4 + $0x1]] }
  0x1d   :  { %v82_v8 = vsub.s32 1, %v2774_v7 }
  0x1f   :  { %2304 = vmatpush3.bf16.msra.mxu0 %v2538_v2  ;;  %v83_v10 = vrot.slane %v2780_v9, %v82_v8 }
  0x20   :  { %2315 = vmatprep.subr.bf16.mxu0 %v2662_v1 }
  0x22   :  { %2306 = vmatmul.mubr.msk.bf16.vlgmr.msra.gmra.mrb[0].mxu0 %vm96_vm1, %v79_v5  ;;  %s2220_s15 = sshll.u32 %s3257_s14, 4 }
  0x23   :  { %2317 = vmatprep.mubr.msk.bf16.mxu0 %vm2663_vm0, %v2662_v1  ;;  %s2044_s18 = scalar_lea.vmem %s3296_s10, %s2220_s15 }
  0xf5   :  { %v134_v11 = vpop.f32.mrb[0].mxu0 }
  0xf6   :  { %v135_v12 = vadd.f32 %v134_v11, %v83_v10  ;;  %v2307_v13 = vpop.f32.mrb[1].mxu0 }
  0xf7   :  { %v137_v14 = vpop.f32.mrb[2].mxu0 }
  0xf8   :  { %v2785_v15 = vpack.c.bf16 %v135_v12, %v135_v12  ;;  %v138_v16 = vadd.f32 %v137_v14, %v83_v10  ;;  %v2308_v17 = vpop.f32.mrb[3].mxu0 }
  0xfa   :  { %144 = vrot.lane.b32.xlu0 %v2785_v15, %s2664_s22  ;;  %v2789_v18 = vpack.c.bf16 %v138_v16, %v138_v16 }
  0xfe   :  { %194 = vrot.lane.b32.xlu0 %v2789_v18, %s2664_s22 }
 0x16c   :  { %v145_v19 = vpop.permute.xlu0 %144 }
 0x16d   :  { %v151_v20 = vsel %vm146_vm2, %v145_v19, 0 }
 0x16e   :  { %2310 = vmatpush3.bf16.xpose.msra.mxu1 %v151_v20 }
 0x16f   :  { %2321 = vmatprep.subr.bf16.mxu1 %v2662_v1 }
 0x170   :  { %v195_v21 = vpop.permute.xlu0 %194 }
 0x171   :  { %v200_v22 = vsel %vm146_vm2, %v195_v21, 0 }
 0x172   :  { %2316 = vmatpush3.bf16.xpose.msra.mxu0 %v200_v22 }
 0x173   :  { %2327 = vmatprep.subr.bf16.mxu0 %v2662_v1 }
 0x175   :  { %2312 = vmatmul.mubr.msk.bf16.vlgmr.msra.gmra.mrb[0].mxu1 %vm146_vm2, %v2785_v15 }
 0x176   :  { %2323 = vmatprep.mubr.msk.bf16.mxu1 %vm2663_vm0, %v2662_v1 }
 0x179   :  { %2318 = vmatmul.mubr.msk.bf16.vlgmr.msra.gmra.mrb[4].mxu0 %vm146_vm2, %v2789_v18 }
 0x17a   :  { %2329 = vmatprep.mubr.msk.bf16.mxu0 %vm2663_vm0, %v2662_v1 }
 0x248   :  { %v187_v23 = vpop.f32.mrb[0].mxu1 }
 0x249   :  { %v242_v24 = vmul.f32 0.25, %v187_v23  ;;  %v2313_v25 = vpop.f32.mrb[1].mxu1 }
 0x24a   :  { %v190_v26 = vpop.f32.mrb[2].mxu1 }
 0x24b   :  { %v2314_v27 = vpop.f32.mrb[3].mxu1  ;;  %v245_v28 = vsel %vm244_vm3, %v242_v24, -inf }
 0x24c   :  { %246 = vmax.xlane.f32.xlu1 %v245_v28  ;;  %v236_v29 = vpop.f32.mrb[4].mxu0 }
 0x24d   :  { %v243_v30 = vmul.f32 0.25, %v236_v29  ;;  %v2319_v31 = vpop.f32.mrb[5].mxu0 }
 0x24e   :  { %v239_v32 = vpop.f32.mrb[6].mxu0 }
 0x24f   :  { %v2320_v33 = vpop.f32.mrb[7].mxu0  ;;  %v248_v34 = vsel %vm244_vm3, %v243_v30, -inf }
 0x250   :  { %249 = vmax.xlane.f32.xlu1 %v248_v34 }
 0x261   :  { %269 = vrot.lane.b32.xlu1 %v2785_v15, %s2665_s23 }
 0x265   :  { %318 = vrot.lane.b32.xlu1 %v2789_v18, %s2665_s23 }
 0x269   :  { %368 = vrot.lane.b32.xlu1 %v2785_v15, %s2666_s24 }
 0x2d9   :  { %v247_v35 = vpop.xlane.xlu1 %246 }
 0x2da   :  { %v251_v36 = vsub.f32 %v242_v24, %v247_v35 }
 0x2dc   :  { %v253_v37 = vmul.f32 1.442695, %v251_v36 }
 0x2dd   :  { %v250_v38 = vpop.xlane.xlu1 %249 }
 0x2de   :  { %2573 = vpow2.f32 %v253_v37  ;;  %v252_v39 = vsub.f32 %v243_v30, %v250_v38 }
 0x2e0   :  { %v255_v40 = vmul.f32 1.442695, %v252_v39 }
 0x2e1   :  { %v270_v41 = vpop.permute.xlu1 %269 }
 0x2e2   :  { %2575 = vpow2.f32 %v255_v40  ;;  %v276_v42 = vsel %vm274_vm4, %v270_v41, 0 }
 0x2e3   :  { %2322 = vmatpush3.bf16.msra.mxu1 %v276_v42 }
 0x2e4   :  { %2333 = vmatprep.subr.bf16.mxu1 %v2662_v1 }
 0x2e5   :  { %v319_v43 = vpop.permute.xlu1 %318 }
 0x2e6   :  { %v324_v44 = vsel %vm274_vm4, %v319_v43, 0 }
 0x2e7   :  { %2328 = vmatpush3.bf16.msra.mxu0 %v324_v44 }
 0x2e8   :  { %v2574_v45 = vpop.eup %2573  ;;  %2339 = vmatprep.subr.bf16.mxu0 %v2662_v1 }
 0x2e9   :  { %v257_v46 = vsel %vm244_vm3, %v2574_v45, 0.0  ;;  %v369_v49 = vpop.permute.xlu1 %368 }
 0x2ea   :  { %258 = vadd.xlane.f32.xlu0 %v257_v46  ;;  %v374_v56 = vsel %vm146_vm2, %v369_v49, 0 }
 0x2ec   :  { %v2576_v47 = vpop.eup %2575 }
 0x2ed   :  { %v260_v48 = vsel %vm244_vm3, %v2576_v47, 0.0 }
 0x2ee   :  { %261 = vadd.xlane.f32.xlu1 %v260_v48  ;;  %v2540_v48 = vld [vmem:[%s3290_s4 + $0x8] sm:$0xff]  }
 0x2ff   :  { %418 = vrot.lane.b32.xlu1 %v2789_v18, %s2666_s24 }
 0x300   :  { %366 = vrot.lane.b32.xlu0 %v2785_v15, %s2667_s25 }
 0x303   :  { %416 = vrot.lane.b32.xlu1 %v2789_v18, %s2667_s25 }
 0x377   :  { %v259_v50 = vpop.xlane.xlu0 %258 }
 0x378   :  { %2577 = vrcp.f32 %v259_v50 }
 0x37b   :  { %v262_v51 = vpop.xlane.xlu1 %261  ;;  %v367_v61 = vpop.permute.xlu0 %366 }
 0x37c   :  { %2579 = vrcp.f32 %v262_v51 }
 0x37f   :  { %v419_v58 = vpop.permute.xlu1 %418 }
 0x380   :  { %v424_v60 = vsel %vm146_vm2, %v419_v58, 0 }
 0x382   :  { %v2578_v52 = vpop.eup %2577 }
 0x383   :  { %v265_v53 = vmul.f32 %v2578_v52, %v2574_v45  ;;  %v417_v62 = vpop.permute.xlu1 %416 }
 0x385   :  { %v267_v54 = vpack.c.bf16 %v265_v53, %v265_v53 }
 0x386   :  { %v2580_v55 = vpop.eup %2579 }
 0x387   :  { %v266_v57 = vmul.f32 %v2580_v55, %v2576_v47  ;;  %2324 = vmatmul.mubr.msk.bf16.vlgmr.msra.gmra.mrb[4].mxu1 %vm244_vm3, %v267_v54  ;;  %v2539_v47 = vld [vmem:[%s3290_s4] sm:$0xff]  }
 0x388   :  { %2334 = vmatpush3.bf16.xpose.msra.mxu1 %v374_v56  ;;  %2335 = vmatprep.mubr.msk.bf16.mxu1 %vm2663_vm0, %v2662_v1 }
 0x389   :  { %v268_v59 = vpack.c.bf16 %v266_v57, %v266_v57  ;;  %2345 = vmatprep.subr.bf16.mxu1 %v2662_v1 }
 0x38b   :  { %2330 = vmatmul.mubr.msk.bf16.vlgmr.msra.gmra.mrb[8].mxu0 %vm244_vm3, %v268_v59 }
 0x38c   :  { %2340 = vmatpush3.bf16.xpose.msra.mxu0 %v424_v60  ;;  %2341 = vmatprep.mubr.msk.bf16.mxu0 %vm2663_vm0, %v2662_v1 }
 0x38d   :  { %2351 = vmatprep.subr.bf16.mxu0 %v2662_v1 }
 0x38f   :  { %2336 = vmatmul.mubr.msk.bf16.vlgmr.msra.gmra.mrb[8].mxu1 %vm146_vm2, %v367_v61 }
 0x390   :  { %2347 = vmatprep.mubr.msk.bf16.mxu1 %vm2663_vm0, %v2662_v1 }
 0x393   :  { %2342 = vmatmul.mubr.msk.bf16.vlgmr.msra.gmra.mrb[12].mxu0 %vm146_vm2, %v417_v62 }
 0x394   :  { %2353 = vmatprep.mubr.msk.bf16.mxu0 %vm2663_vm0, %v2662_v1 }
 0x45a   :  { %v2841_v63 = vpop.f32.mrb[4].mxu1 }
 0x45b   :  { %v2325_v0 = vpop.f32.mrb[5].mxu1 }
 0x45c   :  { %v315_v2 = vpop.f32.mrb[6].mxu1 }
 0x45d   :  { %v2326_v5 = vpop.f32.mrb[7].mxu1  ;;  %v601_v2 = vsub.s32 2, %v2774_v7 }
 0x45e   :  { %v2843_v6 = vpop.f32.mrb[8].mxu0 }
 0x45f   :  { %v2331_v10 = vpop.f32.mrb[9].mxu0  ;;  %v602_v5 = vrot.slane %v2780_v9, %v601_v2 }
 0x460   :  { %v363_v11 = vpop.f32.mrb[10].mxu0 }
 0x461   :  { %v2332_v12 = vpop.f32.mrb[11].mxu0 }
 0x462   :  { %v410_v13 = vpop.f32.mrb[8].mxu1 }
 0x463   :  { %v466_v14 = vmul.f32 0.25, %v410_v13  ;;  %v2337_v16 = vpop.f32.mrb[9].mxu1 }
 0x464   :  { %v413_v17 = vpop.f32.mrb[10].mxu1 }
 0x465   :  { %v2338_v19 = vpop.f32.mrb[11].mxu1  ;;  %v468_v20 = vsel %vm244_vm3, %v466_v14, -inf }
 0x466   :  { %469 = vmax.xlane.f32.xlu1 %v468_v20  ;;  %v460_v21 = vpop.f32.mrb[12].mxu0 }
 0x467   :  { %v467_v22 = vmul.f32 0.25, %v460_v21  ;;  %v2343_v23 = vpop.f32.mrb[13].mxu0 }
 0x468   :  { %v463_v24 = vpop.f32.mrb[14].mxu0 }
 0x469   :  { %v2344_v25 = vpop.f32.mrb[15].mxu0  ;;  %v471_v26 = vsel %vm244_vm3, %v467_v22, -inf }
 0x46a   :  { %472 = vmax.xlane.f32.xlu0 %v471_v26 }
 0x480   :  { %540 = vrot.lane.b32.xlu0 %v2789_v18, %s2668_s26 }
 0x4f3   :  { %v470_v27 = vpop.xlane.xlu1 %469 }
 0x4f4   :  { %v474_v28 = vsub.f32 %v466_v14, %v470_v27 }
 0x4f6   :  { %v476_v29 = vmul.f32 1.442695, %v474_v28 }
 0x4f7   :  { %v473_v30 = vpop.xlane.xlu0 %472 }
 0x4f8   :  { %2581 = vpow2.f32 %v476_v29  ;;  %v475_v31 = vsub.f32 %v467_v22, %v473_v30  ;;  %v2542_v29 = vld [vmem:[%s3291_s5 + $0x8] sm:$0xff]  }
 0x4fa   :  { %v478_v32 = vmul.f32 1.442695, %v475_v31 }
 0x4fb   :  { %v541_v33 = vpop.permute.xlu0 %540 }
 0x4fc   :  { %2583 = vpow2.f32 %v478_v32  ;;  %v546_v34 = vsel %vm274_vm4, %v541_v33, 0 }
 0x4fd   :  { %2352 = vmatpush3.bf16.msra.mxu0 %v546_v34 }
 0x4fe   :  { %2365 = vmatprep.subr.bf16.mxu0 %v2662_v1 }
 0x502   :  { %v2582_v35 = vpop.eup %2581 }
 0x503   :  { %v480_v36 = vsel %vm244_vm3, %v2582_v35, 0.0 }
 0x504   :  { %481 = vadd.xlane.f32.xlu1 %v480_v36  ;;  %v690_v36 = vsub.s32 3, %v2774_v7 }
 0x506   :  { %v2584_v37 = vpop.eup %2583 }
 0x507   :  { %v483_v18 = vsel %vm244_vm3, %v2584_v37, 0.0 }
 0x508   :  { %484 = vadd.xlane.f32.xlu1 %v483_v18  ;;  %v696_v18 = vsub.s32 4, %v2774_v7 }
 0x519   :  { %492 = vrot.lane.b32.xlu1 %v2785_v15, %s2668_s26 }
 0x591   :  { %v482_v38 = vpop.xlane.xlu1 %481 }
 0x592   :  { %2585 = vrcp.f32 %v482_v38 }
 0x595   :  { %v485_v39 = vpop.xlane.xlu1 %484 }
 0x596   :  { %2587 = vrcp.f32 %v485_v39 }
 0x599   :  { %v493_v40 = vpop.permute.xlu1 %492 }
 0x59a   :  { %v498_v41 = vsel %vm274_vm4, %v493_v40, 0 }
 0x59b   :  { %2346 = vmatpush3.bf16.msra.mxu1 %v498_v41 }
 0x59c   :  { %v2586_v42 = vpop.eup %2585  ;;  %2357 = vmatprep.subr.bf16.mxu1 %v2662_v1 }
 0x59d   :  { %v488_v43 = vmul.f32 %v2586_v42, %v2582_v35 }
 0x59f   :  { %v490_v44 = vpack.c.bf16 %v488_v43, %v488_v43  ;;  %v697_v43 = vrot.slane %v2780_v9, %v696_v18 }
 0x5a0   :  { %v2588_v45 = vpop.eup %2587 }
 0x5a1   :  { %v489_v46 = vmul.f32 %v2588_v45, %v2584_v37  ;;  %2348 = vmatmul.mubr.msk.bf16.vlgmr.msra.gmra.mrb[12].mxu1 %vm244_vm3, %v490_v44  ;;  %v691_v37 = vrot.slane %v2780_v9, %v690_v36 }
 0x5a2   :  { %2361 = vmatprep.mubr.msk.bf16.mxu1 %vm2663_vm0, %v2662_v1  ;;  %2358 = vmatpush3.bf16.msra.mxu1 %v2539_v47  ;;  %v2543_v47 = vld [vmem:[%s3292_s6] sm:$0xff]  }
 0x5a3   :  { %v491_v15 = vpack.c.bf16 %v489_v46, %v489_v46  ;;  %2359 = vmatprep.subr.bf16.mxu1 %v2662_v1 }
 0x5a5   :  { %2354 = vmatmul.mubr.msk.bf16.vlgmr.msra.gmra.mrb[16].mxu0 %vm244_vm3, %v491_v15 }
 0x5a6   :  { %2369 = vmatprep.mubr.msk.bf16.mxu0 %vm2663_vm0, %v2662_v1  ;;  %2360 = vmatpush3.bf16.msra.mxu1 %v2540_v48  ;;  %v2544_v48 = vld [vmem:[%s3292_s6 + $0x8] sm:$0xff]  }
 0x5a7   :  { %2373 = vmatprep.subr.bf16.mxu1 %v2662_v1 }
 0x674   :  { %v534_v49 = vpop.f32.mrb[12].mxu1 }
 0x675   :  { %v2349_v50 = vpop.f32.mrb[13].mxu1 }
 0x676   :  { %v537_v51 = vpop.f32.mrb[14].mxu1  ;;  %v2546_v50 = vld [vmem:[%s3292_s6 + $0x18] sm:$0xff]  }
 0x677   :  { %v2350_v52 = vpop.f32.mrb[15].mxu1  ;;  %v2547_v51 = vld [vmem:[%s3292_s6 + $0x20] sm:$0xff]  }
 0x678   :  { %v582_v53 = vpop.f32.mrb[16].mxu0  ;;  %v2548_v52 = vld [vmem:[%s3292_s6 + $0x28] sm:$0xff]  }
 0x679   :  { %v2527_v54 = vpack.i.bf16 %v582_v53, %v534_v49  ;;  %v2355_v55 = vpop.f32.mrb[17].mxu0  ;;  %v2545_v49 = vld [vmem:[%s3292_s6 + $0x10] sm:$0xff]  }
 0x67a   :  { %v585_v56 = vpop.f32.mrb[18].mxu0  ;;  %v2549_v53 = vld [vmem:[%s3292_s6 + $0x30] sm:$0xff]   ;;  %v703_v55 = vsub.s32 0, %v2774_v7 }
 0x67b   :  { %2528 = vrot.lane.b32.xlu1 %v2527_v54, %s2669_s1  ;;  %v2356_v57 = vpop.f32.mrb[19].mxu0  ;;  %v2550_v54 = vld [vmem:[%s3292_s6 + $0x38] sm:$0xff]  }
 0x67c   :  { %v704_v56 = vrot.slane %v2780_v9, %v703_v55 }
 0x6ed   :  { %v2529_v58 = vpop.permute.xlu1 %2528 }
 0x6ee   :  { %v2531_v59 = vunpack.i.h.bf16 %v2529_v58  ;;  %v2530_v60 = vunpack.i.l.bf16 %v2529_v58 }
 0x6f0   :  { %v597_v61 = vsel %vm146_vm2, %v2843_v6, %v2531_v59  ;;  %v596_v62 = vsel %vm146_vm2, %v2841_v63, %v2530_v60 }
 0x6f1   :  { %v598_v0 = vpack.c.bf16 %v597_v61, %v596_v62 }
 0x6f3   :  { %2362 = vmatmul.mubr.msk.bf16.vlgmr.msra.gmra.mrb[16].mxu1 %vm96_vm1, %v598_v0 }
 0x6f4   :  { %2389 = vmatprep.mubr.msk.bf16.mxu1 %vm2663_vm0, %v2662_v1  ;;  %2374 = vmatpush3.bf16.msra.mxu1 %v2543_v47 }
 0x6f5   :  { %2375 = vmatprep.subr.bf16.mxu1 %v2662_v1 }
 0x6f8   :  { %2376 = vmatpush3.bf16.msra.mxu1 %v2544_v48  ;;  %v2552_v48 = vld [vmem:[%s3289_s3 + $0x18] sm:$0xff]  }
 0x6f9   :  { %2377 = vmatprep.subr.bf16.mxu1 %v2662_v1 }
 0x6fc   :  { %2378 = vmatpush3.bf16.msra.mxu1 %v2545_v49 }
 0x6fd   :  { %2379 = vmatprep.subr.bf16.mxu1 %v2662_v1 }
 0x700   :  { %2380 = vmatpush3.bf16.msra.mxu1 %v2546_v50 }
 0x701   :  { %2381 = vmatprep.subr.bf16.mxu1 %v2662_v1 }
 0x704   :  { %2382 = vmatpush3.bf16.msra.mxu1 %v2547_v51 }
 0x705   :  { %2383 = vmatprep.subr.bf16.mxu1 %v2662_v1 }
 0x708   :  { %2384 = vmatpush3.bf16.msra.mxu1 %v2548_v52 }
 0x709   :  { %2385 = vmatprep.subr.bf16.mxu1 %v2662_v1 }
 0x70c   :  { %2386 = vmatpush3.bf16.msra.mxu1 %v2549_v53 }
 0x70d   :  { %2387 = vmatprep.subr.bf16.mxu1 %v2662_v1 }
 0x710   :  { %2388 = vmatpush3.bf16.msra.mxu1 %v2550_v54 }
 0x711   :  { %2419 = vmatprep.subr.bf16.mxu1 %v2662_v1 }
 0x7c6   :  { %v652_v10 = vpop.f32.mrb[16].mxu1 }
 0x7c7   :  { %v653_v11 = vadd.f32 %v652_v10, %v602_v5  ;;  %v2363_v12 = vpop.f32.mrb[17].mxu1 }
 0x7c8   :  { %v655_v13 = vpop.f32.mrb[18].mxu1 }
 0x7c9   :  { %v656_v6 = vadd.f32 %v655_v13, %v602_v5  ;;  %v2364_v14 = vpop.f32.mrb[19].mxu1  ;;  %v659_v63 = vadd.f32 %v653_v11, %v2758_v3 }
 0x7cb   :  { %v661_v16 = vsel %vm96_vm1, %v659_v63, 0.0  ;;  %v660_v17 = vadd.f32 %v656_v6, %v2763_v4  ;;  %v2541_v4 = vld [vmem:[%s3291_s5] sm:$0xff]  }
 0x7cc   :  { %662 = vadd.xlane.f32.xlu1 %v661_v16  ;;  %2366 = vmatpush3.bf16.msra.mxu0 %v2541_v4 }
 0x7cd   :  { %v664_v19 = vsel %vm96_vm1, %v660_v17, 0.0  ;;  %2367 = vmatprep.subr.bf16.mxu0 %v2662_v1 }
 0x7ce   :  { %665 = vadd.xlane.f32.xlu0 %v664_v19 }
 0x7d0   :  { %2368 = vmatpush3.bf16.msra.mxu0 %v2542_v29 }
 0x7d1   :  { %2393 = vmatprep.subr.bf16.mxu0 %v2662_v1 }
 0x859   :  { %v663_v20 = vpop.xlane.xlu1 %662 }
 0x85a   :  { %v668_v21 = vmul.f32 0.03125, %v663_v20 }
 0x85b   :  { %v666_v22 = vpop.xlane.xlu0 %665 }
 0x85c   :  { %v670_v23 = vsub.f32 %v659_v63, %v668_v21  ;;  %v669_v24 = vmul.f32 0.03125, %v666_v22 }
 0x85e   :  { %v671_v25 = vsub.f32 %v660_v17, %v669_v24  ;;  %v672_v26 = vmul.f32 %v670_v23, %v670_v23 }
 0x860   :  { %v674_v27 = vsel %vm96_vm1, %v672_v26, 0.0  ;;  %v673_v28 = vmul.f32 %v671_v25, %v671_v25 }
 0x861   :  { %675 = vadd.xlane.f32.xlu0 %v674_v27  ;;  %v782_v27 = vsub.s32 7, %v2774_v7 }
 0x862   :  { %v677_v3 = vsel %vm96_vm1, %v673_v28, 0.0 }
 0x863   :  { %678 = vadd.xlane.f32.xlu1 %v677_v3  ;;  %v783_v28 = vrot.slane %v2780_v9, %v782_v27 }
 0x8ee   :  { %v676_v30 = vpop.xlane.xlu0 %675 }
 0x8ef   :  { %v680_v31 = vmul.f32 0.03125, %v676_v30 }
 0x8f0   :  { %v679_v32 = vpop.xlane.xlu1 %678 }
 0x8f1   :  { %v682_v33 = vadd.f32 1e-12, %v680_v31  ;;  %v681_v34 = vmul.f32 0.03125, %v679_v32 }
 0x8f3   :  { %2589 = vrsqrt.f32 %v682_v33  ;;  %v683_v35 = vadd.f32 1e-12, %v681_v34 }
 0x8f5   :  { %2591 = vrsqrt.f32 %v683_v35 }
 0x8fd   :  { %v2590_v38 = vpop.eup %2589 }
 0x8fe   :  { %v686_v39 = vmul.f32 %v2590_v38, %v670_v23 }
 0x8ff   :  { %v2592_v40 = vpop.eup %2591 }
 0x900   :  { %v692_v41 = vmul.f32 %v691_v37, %v686_v39  ;;  %v687_v42 = vmul.f32 %v2592_v40, %v671_v25 }
 0x902   :  { %v693_v44 = vmul.f32 %v691_v37, %v687_v42  ;;  %v2905_v45 = vadd.f32 %v697_v43, %v692_v41 }
 0x904   :  { %v2907_v46 = vadd.f32 %v697_v43, %v693_v44 }
 0x906   :  { %v700_v15 = vpack.c.bf16 %v2907_v46, %v2905_v45 }
 0x908   :  { %2370 = vmatmul.mubr.msk.bf16.vlgmr.msra.gmra.mrb[20].mxu0 %vm96_vm1, %v700_v15 }
 0x909   :  { %2397 = vmatprep.mubr.msk.bf16.mxu0 %vm2663_vm0, %v2662_v1 }
 0x9db   :  { %v754_v57 = vpop.f32.mrb[20].mxu0 }
 0x9dc   :  { %v755_v58 = vadd.f32 %v754_v57, %v704_v56  ;;  %v2371_v59 = vpop.f32.mrb[21].mxu0 }
 0x9dd   :  { %v757_v60 = vpop.f32.mrb[22].mxu0 }
 0x9de   :  { %v763_v61 = vmul.f32 0.044715, %v755_v58  ;;  %v758_v62 = vadd.f32 %v757_v60, %v704_v56  ;;  %v2372_v0 = vpop.f32.mrb[23].mxu0  ;;  %v761_v21 = vmul.f32 0.5, %v755_v58  ;;  %v903_v56 = vsub.s32 5, %v2774_v7 }
 0x9e0   :  { %v765_v5 = vmul.f32 %v763_v61, %v755_v58  ;;  %v764_v10 = vmul.f32 0.044715, %v758_v62  ;;  %v762_v22 = vmul.f32 0.5, %v758_v62  ;;  %v904_v57 = vrot.slane %v2780_v9, %v903_v56 }
 0x9e2   :  { %v767_v11 = vmul.f32 %v765_v5, %v755_v58  ;;  %v766_v12 = vmul.f32 %v764_v10, %v758_v62 }
 0x9e4   :  { %v769_v13 = vadd.f32 %v767_v11, %v755_v58  ;;  %v768_v6 = vmul.f32 %v766_v12, %v758_v62  ;;  %v909_v58 = vsub.s32 6, %v2774_v7 }
 0x9e6   :  { %v771_v14 = vmul.f32 0.7978846, %v769_v13  ;;  %v770_v63 = vadd.f32 %v768_v6, %v758_v62  ;;  %v910_v5 = vrot.slane %v2780_v9, %v909_v58  ;;  %v2990_v6 = vld [vmem:[%s3293_s7 + $0x8] sm:$0xff] }
 0x9e7   :  { %v951_v9 = vrot.slane %v2990_v6, %v82_v8 }
 0x9e8   :  { %2593 = vtanh.f32 %v771_v14  ;;  %v772_v16 = vmul.f32 0.7978846, %v770_v63 }
 0x9ea   :  { %2595 = vtanh.f32 %v772_v16 }
 0x9f2   :  { %v2594_v17 = vpop.eup %2593 }
 0x9f3   :  { %v775_v19 = vadd.f32 1.0, %v2594_v17 }
 0x9f4   :  { %v2596_v20 = vpop.eup %2595 }
 0x9f5   :  { %v776_v23 = vadd.f32 1.0, %v2596_v20  ;;  %v777_v24 = vmul.f32 %v775_v19, %v761_v21 }
 0x9f7   :  { %v778_v25 = vmul.f32 %v776_v23, %v762_v22 }
 0x9f9   :  { %v779_v26 = vpack.c.bf16 %v778_v25, %v777_v24 }
 0x9fb   :  { %2390 = vmatmul.mubr.bf16.vlgmr.msra.gmra.mrb[20].mxu1 %v779_v26 }
 0x9fc   :  { %2421 = vmatprep.mubr.msk.bf16.mxu1 %vm2663_vm0, %v2662_v1 }
 0xace   :  { %v866_v3 = vpop.f32.mrb[20].mxu1 }
 0xacf   :  { %v867_v4 = vadd.f32 %v866_v3, %v783_v28  ;;  %v2391_v29 = vpop.f32.mrb[21].mxu1 }
 0xad0   :  { %v869_v30 = vpop.f32.mrb[22].mxu1 }
 0xad1   :  { %v870_v31 = vadd.f32 %v869_v30, %v783_v28  ;;  %v2392_v32 = vpop.f32.mrb[23].mxu1  ;;  %v873_v33 = vadd.f32 %v867_v4, %v2905_v45 }
 0xad3   :  { %v875_v34 = vsel %vm96_vm1, %v873_v33, 0.0  ;;  %v874_v35 = vadd.f32 %v870_v31, %v2907_v46  ;;  %v2551_v46 = vld [vmem:[%s3289_s3 + $0x10] sm:$0xff]  }
 0xad4   :  { %876 = vadd.xlane.f32.xlu0 %v875_v34  ;;  %2394 = vmatpush3.bf16.msra.mxu0 %v2551_v46 }
 0xad5   :  { %v878_v37 = vsel %vm96_vm1, %v874_v35, 0.0  ;;  %2395 = vmatprep.subr.bf16.mxu0 %v2662_v1 }
 0xad6   :  { %879 = vadd.xlane.f32.xlu1 %v878_v37 }
 0xad8   :  { %2396 = vmatpush3.bf16.msra.mxu0 %v2552_v48 }
 0xad9   :  { %2401 = vmatprep.subr.bf16.mxu0 %v2662_v1 }
 0xb61   :  { %v877_v38 = vpop.xlane.xlu0 %876 }
 0xb62   :  { %v881_v39 = vmul.f32 0.03125, %v877_v38 }
 0xb63   :  { %v880_v40 = vpop.xlane.xlu1 %879 }
 0xb64   :  { %v883_v41 = vsub.f32 %v873_v33, %v881_v39  ;;  %v882_v42 = vmul.f32 0.03125, %v880_v40 }
 0xb66   :  { %v884_v43 = vsub.f32 %v874_v35, %v882_v42  ;;  %v885_v44 = vmul.f32 %v883_v41, %v883_v41 }
 0xb68   :  { %v887_v15 = vsel %vm96_vm1, %v885_v44, 0.0  ;;  %v886_v47 = vmul.f32 %v884_v43, %v884_v43 }
 0xb69   :  { %888 = vadd.xlane.f32.xlu0 %v887_v15 }
 0xb6a   :  { %v890_v45 = vsel %vm96_vm1, %v886_v47, 0.0 }
 0xb6b   :  { %891 = vadd.xlane.f32.xlu1 %v890_v45 }
 0xbf6   :  { %v889_v49 = vpop.xlane.xlu0 %888 }
 0xbf7   :  { %v893_v50 = vmul.f32 0.03125, %v889_v49 }
 0xbf8   :  { %v892_v51 = vpop.xlane.xlu1 %891 }
 0xbf9   :  { %v895_v52 = vadd.f32 1e-12, %v893_v50  ;;  %v894_v53 = vmul.f32 0.03125, %v892_v51 }
 0xbfb   :  { %2597 = vrsqrt.f32 %v895_v52  ;;  %v896_v54 = vadd.f32 1e-12, %v894_v53 }
 0xbfd   :  { %2599 = vrsqrt.f32 %v896_v54 }
 0xc05   :  { %v2598_v59 = vpop.eup %2597 }
 0xc06   :  { %v899_v60 = vmul.f32 %v2598_v59, %v883_v41 }
 0xc07   :  { %v2600_v61 = vpop.eup %2599 }
 0xc08   :  { %v905_v62 = vmul.f32 %v904_v57, %v899_v60  ;;  %v900_v0 = vmul.f32 %v2600_v61, %v884_v43 }
 0xc0a   :  { %v906_v10 = vmul.f32 %v904_v57, %v900_v0  ;;  %v2978_v11 = vadd.f32 %v910_v5, %v905_v62 }
 0xc0c   :  { %v2980_v12 = vadd.f32 %v910_v5, %v906_v10 }
 0xc0e   :  { %v947_v13 = vpack.c.bf16 %v2980_v12, %v2978_v11 }
 0xc10   :  { %2398 = vmatmul.mubr.msk.bf16.vlgmr.msra.gmra.mrb[24].mxu0 %vm96_vm1, %v947_v13 }
 0xc11   :  { %2403 = vmatprep.mubr.msk.bf16.mxu0 %vm2663_vm0, %v2662_v1 }
 0xce3   :  { %v1001_v14 = vpop.f32.mrb[24].mxu0 }
 0xce4   :  { %v1002_v63 = vadd.f32 %v1001_v14, %v951_v9  ;;  %v2399_v16 = vpop.f32.mrb[25].mxu0 }
 0xce5   :  { %v1004_v17 = vpop.f32.mrb[26].mxu0 }
 0xce6   :  { %v2995_v19 = vpack.c.bf16 %v1002_v63, %v1002_v63  ;;  %v1005_v20 = vadd.f32 %v1004_v17, %v951_v9  ;;  %v2400_v21 = vpop.f32.mrb[27].mxu0  ;;  %v3046_v9 = vld [vmem:[%s3298_s12] sm:$0xff] }
 0xce8   :  { %v2997_v22 = vpack.c.bf16 %v1005_v20, %v1005_v20  ;;  %1011 = vrot.lane.b32.xlu0 %v2995_v19, %s2664_s22 }
 0xcea   :  { %1060 = vrot.lane.b32.xlu1 %v2997_v22, %s2664_s22 }
 0xd5a   :  { %v1012_v23 = vpop.permute.xlu0 %1011 }
 0xd5b   :  { %v1017_v24 = vsel %vm146_vm2, %v1012_v23, 0 }
 0xd5c   :  { %2402 = vmatpush3.bf16.xpose.msra.mxu0 %v1017_v24  ;;  %v1061_v8 = vpop.permute.xlu1 %1060 }
 0xd5d   :  { %2407 = vmatprep.subr.bf16.mxu0 %v2662_v1  ;;  %v1066_v25 = vsel %vm146_vm2, %v1061_v8, 0 }
 0xd63   :  { %2404 = vmatmul.mubr.msk.bf16.vlgmr.msra.gmra.mrb[28].mxu0 %vm146_vm2, %v2995_v19 }
 0xd64   :  { %2408 = vmatpush3.bf16.xpose.msra.mxu0 %v1066_v25  ;;  %2409 = vmatprep.mubr.msk.bf16.mxu0 %vm2663_vm0, %v2662_v1 }
 0xd65   :  { %2413 = vmatprep.subr.bf16.mxu0 %v2662_v1 }
 0xd6b   :  { %2410 = vmatmul.mubr.msk.bf16.vlgmr.msra.gmra.mrb[32].mxu0 %vm146_vm2, %v2997_v22 }
 0xd6c   :  { %2415 = vmatprep.mubr.msk.bf16.mxu0 %vm2663_vm0, %v2662_v1 }
 0xe36   :  { %v1053_v26 = vpop.f32.mrb[28].mxu0 }
 0xe37   :  { %v1108_v28 = vmul.f32 0.25, %v1053_v26  ;;  %v2405_v3 = vpop.f32.mrb[29].mxu0 }
 0xe38   :  { %v1056_v4 = vpop.f32.mrb[30].mxu0 }
 0xe39   :  { %v2406_v29 = vpop.f32.mrb[31].mxu0  ;;  %v1110_v30 = vsel %vm244_vm3, %v1108_v28, -inf }
 0xe3a   :  { %1111 = vmax.xlane.f32.xlu1 %v1110_v30 }
 0xe3e   :  { %v1102_v31 = vpop.f32.mrb[32].mxu0 }
 0xe3f   :  { %v1109_v32 = vmul.f32 0.25, %v1102_v31  ;;  %v2411_v33 = vpop.f32.mrb[33].mxu0 }
 0xe40   :  { %v1105_v34 = vpop.f32.mrb[34].mxu0 }
 0xe41   :  { %v2412_v35 = vpop.f32.mrb[35].mxu0  ;;  %v1113_v37 = vsel %vm244_vm3, %v1109_v32, -inf }
 0xe42   :  { %1114 = vmax.xlane.f32.xlu0 %v1113_v37 }
 0xe4b   :  { %1182 = vrot.lane.b32.xlu1 %v2997_v22, %s2665_s23 }
 0xe58   :  { %1134 = vrot.lane.b32.xlu0 %v2995_v19, %s2665_s23  ;;  %s2049_s23 = scalar_lea.vmem %s3297_s11, %s3257_s14 }
 0xec7   :  { %v1112_v38 = vpop.xlane.xlu1 %1111 }
 0xec8   :  { %v1116_v39 = vsub.f32 %v1108_v28, %v1112_v38 }
 0xeca   :  { %v1118_v40 = vmul.f32 1.442695, %v1116_v39 }
 0xecb   :  { %v1183_v41 = vpop.permute.xlu1 %1182 }
 0xecc   :  { %2601 = vpow2.f32 %v1118_v40  ;;  %v1188_v42 = vsel %vm274_vm4, %v1183_v41, 0 }
 0xecd   :  { %2420 = vmatpush3.bf16.msra.mxu1 %v1188_v42 }
 0xece   :  { %2431 = vmatprep.subr.bf16.mxu1 %v2662_v1 }
 0xecf   :  { %v1115_v43 = vpop.xlane.xlu0 %1114 }
 0xed0   :  { %v1117_v44 = vsub.f32 %v1109_v32, %v1115_v43 }
 0xed2   :  { %v1120_v15 = vmul.f32 1.442695, %v1117_v44 }
 0xed3   :  { %v1135_v47 = vpop.permute.xlu0 %1134 }
 0xed4   :  { %2603 = vpow2.f32 %v1120_v15  ;;  %v1140_v45 = vsel %vm274_vm4, %v1135_v47, 0 }
 0xed5   :  { %2414 = vmatpush3.bf16.msra.mxu0 %v1140_v45 }
 0xed6   :  { %v2602_v46 = vpop.eup %2601  ;;  %2425 = vmatprep.subr.bf16.mxu0 %v2662_v1 }
 0xed7   :  { %v1122_v48 = vsel %vm244_vm3, %v2602_v46, 0.0 }
 0xed8   :  { %1123 = vadd.xlane.f32.xlu0 %v1122_v48 }
 0xede   :  { %v2604_v49 = vpop.eup %2603 }
 0xedf   :  { %v1125_v50 = vsel %vm244_vm3, %v2604_v49, 0.0 }
 0xee0   :  { %1126 = vadd.xlane.f32.xlu1 %v1125_v50 }
 0xeee   :  { %1282 = vrot.lane.b32.xlu0 %v2997_v22, %s2666_s24 }
 0xef1   :  { %1232 = vrot.lane.b32.xlu1 %v2995_v19, %s2666_s24 }
 0xef2   :  { %1280 = vrot.lane.b32.xlu0 %v2997_v22, %s2667_s25 }
 0xef5   :  { %1230 = vrot.lane.b32.xlu1 %v2995_v19, %s2667_s25  ;;  %s1778_s25 = sld [smem:[#allocation3]] }
 0xf65   :  { %v1124_v51 = vpop.xlane.xlu0 %1123 }
 0xf66   :  { %2605 = vrcp.f32 %v1124_v51 }
 0xf69   :  { %v1283_v0 = vpop.permute.xlu0 %1282 }
 0xf6a   :  { %v1288_v13 = vsel %vm146_vm2, %v1283_v0, 0 }
 0xf6d   :  { %v1127_v52 = vpop.xlane.xlu1 %1126 }
 0xf6e   :  { %2607 = vrcp.f32 %v1127_v52 }
 0xf70   :  { %v2606_v53 = vpop.eup %2605 }
 0xf71   :  { %v1130_v54 = vmul.f32 %v2606_v53, %v2602_v46  ;;  %v1233_v57 = vpop.permute.xlu1 %1232 }
 0xf72   :  { %v1238_v60 = vsel %vm146_vm2, %v1233_v57, 0  ;;  %v2553_v57 = vld [vmem:[%s3290_s4 + $0x10] sm:$0xff]  }
 0xf73   :  { %v1132_v59 = vpack.c.bf16 %v1130_v54, %v1130_v54 }
 0xf75   :  { %2416 = vmatmul.mubr.msk.bf16.vlgmr.msra.gmra.mrb[36].mxu0 %vm244_vm3, %v1132_v59  ;;  %v1231_v10 = vpop.permute.xlu1 %1230  ;;  %v2554_v59 = vld [vmem:[%s3290_s4 + $0x18] sm:$0xff]   ;;  %s2199_s4 = sld [smem:[#allocation3 + $0x80]] }
 0xf76   :  { %2426 = vmatpush3.bf16.xpose.msra.mxu0 %v1238_v60  ;;  %2427 = vmatprep.mubr.msk.bf16.mxu0 %vm2663_vm0, %v2662_v1 }
 0xf77   :  { %2437 = vmatprep.subr.bf16.mxu0 %v2662_v1  ;;  %v1281_v1 = vpop.permute.xlu0 %1280 }
 0xf78   :  { %v2608_v61 = vpop.eup %2607 }
 0xf79   :  { %v1131_v62 = vmul.f32 %v2608_v61, %v2604_v49 }
 0xf7b   :  { %v1133_v5 = vpack.c.bf16 %v1131_v62, %v1131_v62 }
 0xf7d   :  { %2422 = vmatmul.mubr.msk.bf16.vlgmr.msra.gmra.mrb[24].mxu1 %vm244_vm3, %v1133_v5  ;;  %2428 = vmatmul.mubr.msk.bf16.vlgmr.msra.gmra.mrb[40].mxu0 %vm146_vm2, %v1231_v10 }
 0xf7e   :  { %2432 = vmatpush3.bf16.xpose.msra.mxu1 %v1288_v13  ;;  %2433 = vmatprep.mubr.msk.bf16.mxu1 %vm2663_vm0, %v3046_v9 }
 0xf7f   :  { %2443 = vmatprep.subr.bf16.mxu1 %v3046_v9  ;;  %2439 = vmatprep.mubr.msk.bf16.mxu0 %vm2663_vm0, %v3046_v9 }
 0xf85   :  { %2434 = vmatmul.mubr.msk.bf16.vlgmr.msra.gmra.mrb[28].mxu1 %vm146_vm2, %v1281_v1 }
 0xf86   :  { %2445 = vmatprep.mubr.msk.bf16.mxu1 %vm2663_vm0, %v3046_v9 }
0x1048   :  { %v3056_v14 = vpop.f32.mrb[36].mxu0 }
0x1049   :  { %v2417_v63 = vpop.f32.mrb[37].mxu0 }
0x104a   :  { %v1179_v16 = vpop.f32.mrb[38].mxu0 }
0x104b   :  { %v2418_v17 = vpop.f32.mrb[39].mxu0 }
0x1050   :  { %v3058_v20 = vpop.f32.mrb[24].mxu1  ;;  %v1274_v21 = vpop.f32.mrb[40].mxu0 }
0x1051   :  { %v1330_v23 = vmul.f32 0.25, %v1274_v21  ;;  %v2423_v24 = vpop.f32.mrb[25].mxu1  ;;  %v2429_v8 = vpop.f32.mrb[41].mxu0 }
0x1052   :  { %v1227_v25 = vpop.f32.mrb[26].mxu1  ;;  %v1277_v26 = vpop.f32.mrb[42].mxu0 }
0x1053   :  { %v2424_v28 = vpop.f32.mrb[27].mxu1  ;;  %v2430_v3 = vpop.f32.mrb[43].mxu0  ;;  %v1332_v4 = vsel %vm244_vm3, %v1330_v23, -inf  ;;  %v1466_v25 = vrot.slane %v2990_v6, %v601_v2 }
0x1054   :  { %1333 = vmax.xlane.f32.xlu1 %v1332_v4 }
0x1058   :  { %v1324_v29 = vpop.f32.mrb[28].mxu1 }
0x1059   :  { %v1331_v30 = vmul.f32 0.25, %v1324_v29  ;;  %v2435_v31 = vpop.f32.mrb[29].mxu1 }
0x105a   :  { %v1327_v32 = vpop.f32.mrb[30].mxu1 }
0x105b   :  { %v2436_v33 = vpop.f32.mrb[31].mxu1  ;;  %v1335_v34 = vsel %vm244_vm3, %v1331_v30, -inf }
0x105c   :  { %1336 = vmax.xlane.f32.xlu0 %v1335_v34 }
0x10e1   :  { %v1334_v35 = vpop.xlane.xlu1 %1333 }
0x10e2   :  { %v1338_v37 = vsub.f32 %v1330_v23, %v1334_v35 }
0x10e4   :  { %v1340_v38 = vmul.f32 1.442695, %v1338_v37 }
0x10e6   :  { %2609 = vpow2.f32 %v1340_v38 }
0x10e9   :  { %v1337_v39 = vpop.xlane.xlu0 %1336 }
0x10ea   :  { %v1339_v40 = vsub.f32 %v1331_v30, %v1337_v39 }
0x10ec   :  { %v1342_v41 = vmul.f32 1.442695, %v1339_v40 }
0x10ee   :  { %2611 = vpow2.f32 %v1342_v41 }
0x10f0   :  { %v2610_v42 = vpop.eup %2609 }
0x10f1   :  { %v1344_v43 = vsel %vm244_vm3, %v2610_v42, 0.0 }
0x10f2   :  { %1345 = vadd.xlane.f32.xlu0 %v1344_v43 }
0x10f8   :  { %v2612_v44 = vpop.eup %2611 }
0x10f9   :  { %v1347_v15 = vsel %vm244_vm3, %v2612_v44, 0.0 }
0x10fa   :  { %1348 = vadd.xlane.f32.xlu1 %v1347_v15 }
0x1108   :  { %1356 = vrot.lane.b32.xlu0 %v2995_v19, %s2668_s26 }
0x110b   :  { %1404 = vrot.lane.b32.xlu1 %v2997_v22, %s2668_s26  ;;  %s2198_s26 = sld [smem:[#allocation3 + $0x1]] }
0x117f   :  { %v1346_v47 = vpop.xlane.xlu0 %1345 }
0x1180   :  { %2613 = vrcp.f32 %v1346_v47 }
0x1183   :  { %v1357_v45 = vpop.permute.xlu0 %1356 }
0x1184   :  { %v1362_v46 = vsel %vm274_vm4, %v1357_v45, 0 }
0x1185   :  { %2438 = vmatpush3.bf16.msra.mxu0 %v1362_v46 }
0x1186   :  { %2449 = vmatprep.subr.bf16.mxu0 %v3046_v9 }
0x1187   :  { %v1349_v48 = vpop.xlane.xlu1 %1348 }
0x1188   :  { %2615 = vrcp.f32 %v1349_v48 }
0x118a   :  { %v2614_v49 = vpop.eup %2613 }
0x118b   :  { %v1352_v50 = vmul.f32 %v2614_v49, %v2610_v42  ;;  %v1405_v51 = vpop.permute.xlu1 %1404  ;;  %v2556_v42 = vld [vmem:[%s3291_s5 + $0x18] sm:$0xff]   ;;  %v1554_v49 = vrot.slane %v2990_v6, %v690_v36  ;;  %v2557_v36 = vld [vmem:[%s3292_s6 + $0x40] sm:$0xff]  }
0x118c   :  { %v1410_v52 = vsel %vm274_vm4, %v1405_v51, 0 }
0x118d   :  { %2444 = vmatpush3.bf16.msra.mxu1 %v1410_v52  ;;  %v1354_v19 = vpack.c.bf16 %v1352_v50, %v1352_v50 }
0x118e   :  { %2457 = vmatprep.subr.bf16.mxu1 %v3046_v9 }
0x118f   :  { %2440 = vmatmul.mubr.msk.bf16.vlgmr.msra.gmra.mrb[44].mxu0 %vm244_vm3, %v1354_v19 }
0x1190   :  { %2453 = vmatprep.mubr.msk.bf16.mxu0 %vm2663_vm0, %v3046_v9  ;;  %2450 = vmatpush3.bf16.msra.mxu0 %v2553_v57 }
0x1191   :  { %2451 = vmatprep.subr.bf16.mxu0 %v3046_v9 }
0x1192   :  { %v2616_v22 = vpop.eup %2615 }
0x1193   :  { %v1353_v53 = vmul.f32 %v2616_v22, %v2612_v44  ;;  %v1560_v22 = vrot.slane %v2990_v6, %v696_v18  ;;  %v2558_v18 = vld [vmem:[%s3292_s6 + $0x48] sm:$0xff]  }
0x1194   :  { %2452 = vmatpush3.bf16.msra.mxu0 %v2554_v59 }
0x1195   :  { %v1355_v54 = vpack.c.bf16 %v1353_v53, %v1353_v53  ;;  %2465 = vmatprep.subr.bf16.mxu0 %v3046_v9 }
0x1197   :  { %2446 = vmatmul.mubr.msk.bf16.vlgmr.msra.gmra.mrb[32].mxu1 %vm244_vm3, %v1355_v54 }
0x1198   :  { %2461 = vmatprep.mubr.msk.bf16.mxu1 %vm2663_vm0, %v3046_v9 }
0x1262   :  { %v1398_v60 = vpop.f32.mrb[44].mxu0 }
0x1263   :  { %v2441_v61 = vpop.f32.mrb[45].mxu0 }
0x1264   :  { %v1401_v62 = vpop.f32.mrb[46].mxu0  ;;  %v2560_v61 = vld [vmem:[%s3292_s6 + $0x58] sm:$0xff]  }
0x1265   :  { %v2442_v0 = vpop.f32.mrb[47].mxu0  ;;  %v2561_v62 = vld [vmem:[%s3292_s6 + $0x60] sm:$0xff]  }
0x1266   :  { %v2562_v0 = vld [vmem:[%s3292_s6 + $0x68] sm:$0xff]  }
0x126a   :  { %v1446_v5 = vpop.f32.mrb[32].mxu1 }
0x126b   :  { %v2532_v10 = vpack.i.bf16 %v1446_v5, %v1398_v60  ;;  %v2447_v13 = vpop.f32.mrb[33].mxu1  ;;  %v2559_v60 = vld [vmem:[%s3292_s6 + $0x50] sm:$0xff]  }
0x126c   :  { %v1449_v1 = vpop.f32.mrb[34].mxu1  ;;  %v2563_v5 = vld [vmem:[%s3292_s6 + $0x70] sm:$0xff]   ;;  %v1567_v13 = vrot.slane %v2990_v6, %v703_v55 }
0x126d   :  { %v2448_v63 = vpop.f32.mrb[35].mxu1  ;;  %2533 = vrot.lane.b32.xlu1 %v2532_v10, %s2669_s1  ;;  %v2564_v10 = vld [vmem:[%s3292_s6 + $0x78] sm:$0xff]   ;;  %s2200_s1 = sld [smem:[#allocation3 + $0x81]] }
0x12df   :  { %v2534_v16 = vpop.permute.xlu1 %2533 }
0x12e0   :  { %v2536_v17 = vunpack.i.h.bf16 %v2534_v16  ;;  %v2535_v21 = vunpack.i.l.bf16 %v2534_v16 }
0x12e2   :  { %v1461_v23 = vsel %vm146_vm2, %v3058_v20, %v2536_v17  ;;  %v1460_v24 = vsel %vm146_vm2, %v3056_v14, %v2535_v21 }
0x12e3   :  { %v1462_v8 = vpack.c.bf16 %v1461_v23, %v1460_v24 }
0x12e5   :  { %2454 = vmatmul.mubr.msk.bf16.vlgmr.msra.gmra.mrb[48].mxu0 %vm96_vm1, %v1462_v8 }
0x12e6   :  { %2481 = vmatprep.mubr.msk.bf16.mxu0 %vm2663_vm0, %v3046_v9  ;;  %2466 = vmatpush3.bf16.msra.mxu0 %v2557_v36  ;;  %v1783_v36 = vstv %s2199_s4 }
0x12e7   :  { %2467 = vmatprep.subr.bf16.mxu0 %v3046_v9  ;;  %vm3188_vm7 = vcmp.ge.s32.totalorder %v2774_v7, %v1783_v36 }
0x12ea   :  { %2468 = vmatpush3.bf16.msra.mxu0 %v2558_v18  ;;  %v1785_v18 = vstv %s2200_s1 }
0x12eb   :  { %2469 = vmatprep.subr.bf16.mxu0 %v3046_v9  ;;  %vm3193_vm8 = vcmp.lt.s32.totalorder %v2774_v7, %v1785_v18 }
0x12ec   :  { %vm1791_vm10 = vmand %vm3188_vm7, %vm3193_vm8 }
0x12ee   :  { %2470 = vmatpush3.bf16.msra.mxu0 %v2559_v60 }
0x12ef   :  { %2471 = vmatprep.subr.bf16.mxu0 %v3046_v9 }
0x12f2   :  { %2472 = vmatpush3.bf16.msra.mxu0 %v2560_v61 }
0x12f3   :  { %2473 = vmatprep.subr.bf16.mxu0 %v3046_v9 }
0x12f6   :  { %2474 = vmatpush3.bf16.msra.mxu0 %v2561_v62 }
0x12f7   :  { %2475 = vmatprep.subr.bf16.mxu0 %v3046_v9 }
0x12fa   :  { %2476 = vmatpush3.bf16.msra.mxu0 %v2562_v0 }
0x12fb   :  { %2477 = vmatprep.subr.bf16.mxu0 %v3046_v9 }
0x12fe   :  { %2478 = vmatpush3.bf16.msra.mxu0 %v2563_v5 }
0x12ff   :  { %2479 = vmatprep.subr.bf16.mxu0 %v3046_v9 }
0x1302   :  { %2480 = vmatpush3.bf16.msra.mxu0 %v2564_v10  ;;  %v1809_v10 = vsel %vm1791_vm10, 1.0, %v3046_v9 }
0x13b8   :  { %v1516_v26 = vpop.f32.mrb[48].mxu0 }
0x13b9   :  { %v1517_v28 = vadd.f32 %v1516_v26, %v1466_v25  ;;  %v2455_v3 = vpop.f32.mrb[49].mxu0 }
0x13ba   :  { %v1519_v4 = vpop.f32.mrb[50].mxu0 }
0x13bb   :  { %v1520_v29 = vadd.f32 %v1519_v4, %v1466_v25  ;;  %v2456_v30 = vpop.f32.mrb[51].mxu0  ;;  %v1523_v20 = vadd.f32 %v1517_v28, %v2978_v11 }
0x13bd   :  { %v1525_v14 = vsel %vm96_vm1, %v1523_v20, 0.0  ;;  %v1524_v31 = vadd.f32 %v1520_v29, %v2980_v12  ;;  %v2555_v12 = vld [vmem:[%s3291_s5 + $0x10] sm:$0xff]  }
0x13be   :  { %1526 = vadd.xlane.f32.xlu0 %v1525_v14  ;;  %2458 = vmatpush3.bf16.msra.mxu1 %v2555_v12 }
0x13bf   :  { %v1528_v32 = vsel %vm96_vm1, %v1524_v31, 0.0  ;;  %2459 = vmatprep.subr.bf16.mxu1 %v3046_v9 }
0x13c0   :  { %1529 = vadd.xlane.f32.xlu1 %v1528_v32 }
0x13c2   :  { %2460 = vmatpush3.bf16.msra.mxu1 %v2556_v42 }
0x13c3   :  { %2485 = vmatprep.subr.bf16.mxu1 %v3046_v9 }
0x144b   :  { %v1527_v33 = vpop.xlane.xlu0 %1526 }
0x144c   :  { %v1531_v34 = vmul.f32 0.03125, %v1527_v33 }
0x144d   :  { %v1530_v35 = vpop.xlane.xlu1 %1529 }
0x144e   :  { %v1533_v2 = vsub.f32 %v1523_v20, %v1531_v34  ;;  %v1532_v37 = vmul.f32 0.03125, %v1530_v35 }
0x1450   :  { %v1534_v38 = vsub.f32 %v1524_v31, %v1532_v37  ;;  %v1535_v39 = vmul.f32 %v1533_v2, %v1533_v2 }
0x1452   :  { %v1537_v40 = vsel %vm96_vm1, %v1535_v39, 0.0  ;;  %v1536_v41 = vmul.f32 %v1534_v38, %v1534_v38 }
0x1453   :  { %1538 = vadd.xlane.f32.xlu0 %v1537_v40 }
0x1454   :  { %v1540_v11 = vsel %vm96_vm1, %v1536_v41, 0.0 }
0x1457   :  { %1541 = vadd.xlane.f32.xlu0 %v1540_v11 }
0x14e0   :  { %v1539_v43 = vpop.xlane.xlu0 %1538 }
0x14e1   :  { %v1543_v44 = vmul.f32 0.03125, %v1539_v43 }
0x14e3   :  { %v1545_v15 = vadd.f32 1e-12, %v1543_v44 }
0x14e4   :  { %v1542_v47 = vpop.xlane.xlu0 %1541 }
0x14e5   :  { %2617 = vrsqrt.f32 %v1545_v15  ;;  %v1544_v45 = vmul.f32 0.03125, %v1542_v47 }
0x14e7   :  { %v1546_v46 = vadd.f32 1e-12, %v1544_v45 }
0x14e9   :  { %2619 = vrsqrt.f32 %v1546_v46 }
0x14ef   :  { %v2618_v48 = vpop.eup %2617 }
0x14f0   :  { %v1549_v50 = vmul.f32 %v2618_v48, %v1533_v2 }
0x14f2   :  { %v1555_v52 = vmul.f32 %v1554_v49, %v1549_v50 }
0x14f3   :  { %v2620_v51 = vpop.eup %2619 }
0x14f4   :  { %v1550_v19 = vmul.f32 %v2620_v51, %v1534_v38  ;;  %v3117_v54 = vadd.f32 %v1560_v22, %v1555_v52  ;;  %v1646_v38 = vrot.slane %v2990_v6, %v782_v27 }
0x14f6   :  { %v1556_v53 = vmul.f32 %v1554_v49, %v1550_v19 }
0x14f8   :  { %v3119_v57 = vadd.f32 %v1560_v22, %v1556_v53  ;;  %v2565_v53 = vld [vmem:[%s3294_s8 + $0x10] sm:$0xff]  }
0x14fa   :  { %v1563_v59 = vpack.c.bf16 %v3119_v57, %v3117_v54 }
0x14fc   :  { %2462 = vmatmul.mubr.msk.bf16.vlgmr.msra.gmra.mrb[36].mxu1 %vm96_vm1, %v1563_v59  ;;  %v1781_v59 = vstv %s2198_s26 }
0x14fd   :  { %2489 = vmatprep.mubr.msk.bf16.mxu1 %vm2663_vm0, %v3046_v9  ;;  %2486 = vmatpush3.bf16.msra.mxu1 %v2565_v53  ;;  %vm3183_vm6 = vcmp.lt.s32.totalorder %v2774_v7, %v1781_v59 }
0x14fe   :  { %2487 = vmatprep.subr.bf16.mxu1 %v3046_v9 }
0x15cf   :  { %v1617_v1 = vpop.f32.mrb[36].mxu1 }
0x15d0   :  { %v1618_v63 = vadd.f32 %v1617_v1, %v1567_v13  ;;  %v2463_v16 = vpop.f32.mrb[37].mxu1  ;;  %v1816_v1 = vrot.slane %v1809_v10, 4 }
0x15d1   :  { %v1620_v17 = vpop.f32.mrb[38].mxu1 }
0x15d2   :  { %v1626_v21 = vmul.f32 0.044715, %v1618_v63  ;;  %v1621_v23 = vadd.f32 %v1620_v17, %v1567_v13  ;;  %v2464_v24 = vpop.f32.mrb[39].mxu1  ;;  %v1624_v32 = vmul.f32 0.5, %v1618_v63 }
0x15d4   :  { %v1628_v8 = vmul.f32 %v1626_v21, %v1618_v63  ;;  %v1627_v25 = vmul.f32 0.044715, %v1621_v23  ;;  %v1625_v33 = vmul.f32 0.5, %v1621_v23  ;;  %v1817_v21 = vadd.f32 %v1816_v1, %v1809_v10 }
0x15d6   :  { %v1630_v26 = vmul.f32 %v1628_v8, %v1618_v63  ;;  %v1629_v28 = vmul.f32 %v1627_v25, %v1621_v23 }
0x15d8   :  { %v1632_v3 = vadd.f32 %v1630_v26, %v1618_v63  ;;  %v1631_v4 = vmul.f32 %v1629_v28, %v1621_v23  ;;  %v1818_v26 = vrot.slane %v1817_v21, 2 }
0x15da   :  { %v1634_v29 = vmul.f32 0.7978846, %v1632_v3  ;;  %v1633_v30 = vadd.f32 %v1631_v4, %v1621_v23  ;;  %v1819_v4 = vadd.f32 %v1818_v26, %v1817_v21 }
0x15dc   :  { %2621 = vtanh.f32 %v1634_v29  ;;  %v1635_v20 = vmul.f32 0.7978846, %v1633_v30  ;;  %v1820_v30 = vrot.slane %v1819_v4, 1 }
0x15de   :  { %2623 = vtanh.f32 %v1635_v20  ;;  %v1767_v20 = vrot.slane %v2990_v6, %v903_v56 }
0x15e6   :  { %v2622_v14 = vpop.eup %2621 }
0x15e7   :  { %v1638_v55 = vadd.f32 1.0, %v2622_v14 }
0x15e8   :  { %v2624_v31 = vpop.eup %2623 }
0x15e9   :  { %v1639_v34 = vadd.f32 1.0, %v2624_v31  ;;  %v1640_v35 = vmul.f32 %v1638_v55, %v1624_v32  ;;  %v1773_v31 = vrot.slane %v2990_v6, %v909_v58 }
0x15eb   :  { %v1641_v2 = vmul.f32 %v1639_v34, %v1625_v33  ;;  %v1821_v34 = vadd.f32 %v1820_v30, %v1819_v4 }
0x15ed   :  { %v1642_v37 = vpack.c.bf16 %v1641_v2, %v1640_v35 }
0x15ef   :  { %2482 = vmatmul.mubr.bf16.vlgmr.msra.gmra.mrb[52].mxu0 %v1642_v37 }
0x16c2   :  { %v1729_v39 = vpop.f32.mrb[52].mxu0 }
0x16c3   :  { %v1730_v40 = vadd.f32 %v1729_v39, %v1646_v38  ;;  %v2483_v41 = vpop.f32.mrb[53].mxu0 }
0x16c4   :  { %v1732_v11 = vpop.f32.mrb[54].mxu0 }
0x16c5   :  { %v1733_v12 = vadd.f32 %v1732_v11, %v1646_v38  ;;  %v2484_v42 = vpop.f32.mrb[55].mxu0  ;;  %v1736_v43 = vadd.f32 %v1730_v40, %v3117_v54  ;;  %v2566_v54 = vld [vmem:[%s3294_s8 + $0x18] sm:$0xff]   ;;  %v1823_v40 = vmax.f32 %v1821_v34, 1.0 }
0x16c6   :  { %2488 = vmatpush3.bf16.msra.mxu1 %v2566_v54  ;;  %v2568_v54 = vld [vmem:[%s3294_s8 + $0x8] sm:$0xff]  }
0x16c7   :  { %v1738_v44 = vsel %vm96_vm1, %v1736_v43, 0.0  ;;  %v1737_v15 = vadd.f32 %v1733_v12, %v3119_v57  ;;  %2493 = vmatprep.subr.bf16.mxu1 %v3046_v9  ;;  %v1779_v57 = vstv %s1778_s25 }
0x16c8   :  { %1739 = vadd.xlane.f32.xlu1 %v1738_v44  ;;  %vm3178_vm5 = vcmp.ge.s32.totalorder %v2774_v7, %v1779_v57 }
0x16c9   :  { %v1741_v47 = vsel %vm96_vm1, %v1737_v15, 0.0  ;;  %vm1790_vm9 = vmand %vm3178_vm5, %vm3183_vm6 }
0x16ca   :  { %1742 = vadd.xlane.f32.xlu0 %v1741_v47  ;;  %v1808_v5 = vsel %vm1790_vm9, 1.0, %v3046_v9 }
0x16cb   :  { %v1810_v13 = vrot.slane %v1808_v5, 4 }
0x16cd   :  { %v1811_v63 = vadd.f32 %v1810_v13, %v1808_v5 }
0x16cf   :  { %v1812_v24 = vrot.slane %v1811_v63, 2 }
0x16d1   :  { %v1813_v3 = vadd.f32 %v1812_v24, %v1811_v63 }
0x16d3   :  { %v1814_v29 = vrot.slane %v1813_v3, 1 }
0x16d5   :  { %v1815_v55 = vadd.f32 %v1814_v29, %v1813_v3 }
0x16d7   :  { %v1822_v37 = vmax.f32 %v1815_v55, 1.0  ;;  %v2572_v55 = vld [vmem:[%s2044_s18 + $0x8] sm:$0xff]  }
0x1755   :  { %v1740_v45 = vpop.xlane.xlu1 %1739 }
0x1756   :  { %v1744_v46 = vmul.f32 0.03125, %v1740_v45 }
0x1757   :  { %v1743_v48 = vpop.xlane.xlu0 %1742 }
0x1758   :  { %v1746_v27 = vsub.f32 %v1736_v43, %v1744_v46  ;;  %v1745_v49 = vmul.f32 0.03125, %v1743_v48 }
0x175a   :  { %v1747_v50 = vsub.f32 %v1737_v15, %v1745_v49  ;;  %v1748_v51 = vmul.f32 %v1746_v27, %v1746_v27 }
0x175c   :  { %v1750_v52 = vsel %vm96_vm1, %v1748_v51, 0.0  ;;  %v1749_v19 = vmul.f32 %v1747_v50, %v1747_v50 }
0x175d   :  { %1751 = vadd.xlane.f32.xlu1 %v1750_v52 }
0x175e   :  { %v1753_v22 = vsel %vm96_vm1, %v1749_v19, 0.0 }
0x175f   :  { %1754 = vadd.xlane.f32.xlu0 %v1753_v22 }
0x17ea   :  { %v1752_v16 = vpop.xlane.xlu1 %1751 }
0x17eb   :  { %v1756_v17 = vmul.f32 0.03125, %v1752_v16 }
0x17ec   :  { %v1755_v23 = vpop.xlane.xlu0 %1754 }
0x17ed   :  { %v1758_v8 = vadd.f32 1e-12, %v1756_v17  ;;  %v1757_v25 = vmul.f32 0.03125, %v1755_v23 }
0x17ef   :  { %2625 = vrsqrt.f32 %v1758_v8  ;;  %v1759_v28 = vadd.f32 1e-12, %v1757_v25  ;;  %v2207_v25 = vld [vmem:[%s3295_s9] ss:$0 sm:$0xff] }
0x17f1   :  { %2627 = vrsqrt.f32 %v1759_v28 }
0x17f2   :  { %2629 = vrcp.f32 %v1822_v37 }
0x17f3   :  { %2631 = vrcp.f32 %v1823_v40 }
0x17f9   :  { %v2626_v14 = vpop.eup %2625 }
0x17fa   :  { %v1762_v32 = vmul.f32 %v2626_v14, %v1746_v27 }
0x17fb   :  { %v2628_v33 = vpop.eup %2627 }
0x17fc   :  { %v1768_v35 = vmul.f32 %v1767_v20, %v1762_v32  ;;  %v1763_v2 = vmul.f32 %v2628_v33, %v1747_v50  ;;  %v2567_v50 = vld [vmem:[%s3294_s8] sm:$0xff]   ;;  %v2630_v53 = vpop.eup %2629  ;;  %s3251_s8 = sld [smem:[#allocation4]] }
0x17fd   :  { %v2632_v36 = vpop.eup %2631 }
0x17fe   :  { %v1774_v38 = vadd.f32 %v1773_v31, %v1768_v35  ;;  %v1769_v39 = vmul.f32 %v1767_v20, %v1763_v2  ;;  %v2571_v20 = vld [vmem:[%s2044_s18] sm:$0xff]  }
0x1800   :  { %v1792_v56 = vsel %vm1790_vm9, %v1774_v38, 0.0  ;;  %v1775_v41 = vadd.f32 %v1773_v31, %v1769_v39  ;;  %v1838_v11 = vpack.c.bf16 %v1774_v38, %v1774_v38 }
0x1801   :  { %v1794_v7 = vsel %vm96_vm1, %v1792_v56, 0.0 }
0x1802   :  { %v1795_v58 = vrot.slane %v1794_v7, 4  ;;  %v1793_v6 = vsel %vm1791_vm10, %v1775_v41, 0.0  ;;  %v1839_v12 = vpack.c.bf16 %v1775_v41, %v1775_v41  ;;  %v1842_v46 = vunpack.c.l.b16 %v1838_v11  ;;  %s2219_s29 = sshll.u32 %s3251_s8, 4  ;;  %s1983_s3 = scalar_lea.vmem %s3297_s11, %s3251_s8 }
0x1803   :  { %v1801_v42 = vsel %vm96_vm1, %v1793_v6, 0.0  ;;  %s1978_s13 = scalar_lea.vmem %s3296_s10, %s2219_s29  ;;  %v1984_v32 = vld [vmem:[%s1983_s3] sm:$0x1] }
0x1804   :  { %v1796_v43 = vadd.f32 %v1795_v58, %v1794_v7  ;;  %v1802_v44 = vrot.slane %v1801_v42, 4  ;;  %v1843_v15 = vunpack.c.l.b16 %v1839_v12  ;;  %v2569_v63 = vld [vmem:[%s1978_s13] sm:$0xff]   ;;  %v2570_v16 = vld [vmem:[%s1978_s13 + $0x8] sm:$0xff]  }
0x1806   :  { %v1797_v47 = vrot.slane %v1796_v43, 2  ;;  %v1803_v45 = vadd.f32 %v1802_v44, %v1801_v42  ;;  %v1844_v48 = vrot.slane %v1843_v15, 7 }
0x1808   :  { %v1804_v27 = vrot.slane %v1803_v45, 2  ;;  %v1846_v49 = vsel %vm1845_vm11, %v1844_v48, %v1842_v46  ;;  %v1798_v51 = vadd.f32 %v1797_v47, %v1796_v43 }
0x1809   :  { %v1847_v52 = vpack.c.b16 %v1846_v49, %v1846_v49 }
0x180a   :  { %v1799_v19 = vrot.slane %v1798_v51, 1  ;;  %v1805_v22 = vadd.f32 %v1804_v27, %v1803_v45 }
0x180b   :  { %2490 = vmatmul.mubr.msk.bf16.vlgmr.msra.gmra.mrb[40].mxu1 %vm96_vm1, %v1847_v52 }
0x180c   :  { %2494 = vmatpush3.bf16.msra.mxu1 %v2567_v50  ;;  %2497 = vmatprep.mubr.msk.bf16.mxu1 %vm2663_vm0, %v3046_v9  ;;  %v1800_v57 = vadd.f32 %v1799_v19, %v1798_v51  ;;  %v1806_v59 = vrot.slane %v1805_v22, 1 }
0x180d   :  { %2495 = vmatprep.subr.bf16.mxu1 %v3046_v9 }
0x180e   :  { %v1807_v18 = vadd.f32 %v1806_v59, %v1805_v22  ;;  %v1825_v60 = vmul.f32 %v2630_v53, %v1800_v57 }
0x1810   :  { %2496 = vmatpush3.bf16.msra.mxu1 %v2568_v54  ;;  %v1827_v61 = vmul.f32 %v2632_v36, %v1807_v18  ;;  %v1836_v62 = vpack.c.bf16 %v1825_v60, %v1825_v60 }
0x1811   :  { %2501 = vmatprep.subr.bf16.mxu1 %v3046_v9 }
0x1812   :  { %v1837_v0 = vpack.c.bf16 %v1827_v61, %v1827_v61  ;;  %v1905_v5 = vunpack.c.l.b16 %v1836_v62 }
0x1814   :  { %v1906_v10 = vunpack.c.l.b16 %v1837_v0 }
0x1816   :  { %v1907_v13 = vsel %vm1845_vm11, %v1906_v10, %v1905_v5 }
0x1817   :  { %v1908_v1 = vpack.c.b16 %v1907_v13, %v1907_v13 }
0x1819   :  { %2498 = vmatmul.mubr.msk.bf16.vlgmr.msra.gmra.mrb[44].mxu1 %vm96_vm1, %v1908_v1 }
0x181a   :  { %2505 = vmatprep.mubr.msk.bf16.mxu1 %vm2663_vm0, %v3046_v9  ;;  %2502 = vmatpush3.bf16.msra.mxu1 %v2569_v63 }
0x181b   :  { %2503 = vmatprep.subr.bf16.mxu1 %v3046_v9 }
0x181e   :  { %2504 = vmatpush3.bf16.msra.mxu1 %v2570_v16 }
0x181f   :  { %2509 = vmatprep.subr.bf16.mxu1 %v3046_v9 }
0x18de   :  { %v1897_v17 = vpop.f32.mrb[40].mxu1 }
0x18df   :  { %v2491_v21 = vpop.f32.mrb[41].mxu1 }
0x18e0   :  { %v1900_v23 = vpop.f32.mrb[42].mxu1 }
0x18e1   :  { %v2492_v24 = vpop.f32.mrb[43].mxu1 }
0x18ec   :  { %v1958_v8 = vpop.f32.mrb[44].mxu1 }
0x18ed   :  { %v1959_v26 = vadd.f32 %v1958_v8, %v1897_v17  ;;  %v2499_v28 = vpop.f32.mrb[45].mxu1 }
0x18ee   :  { %v1961_v3 = vpop.f32.mrb[46].mxu1 }
0x18ef   :  { %v1971_v4 = vadd.f32 %v2207_v25, %v1959_v26  ;;  %v2500_v29 = vpop.f32.mrb[47].mxu1 }
0x18f1   :  { %v1972_v30 = vmax.f32 %v1971_v4, 0.0 }
0x18f3   :  { %v1975_v14 = vpack.c.bf16 %v1972_v30, %v1972_v30 }
0x18f5   :  { %2506 = vmatmul.mubr.msk.bf16.vlgmr.msra.gmra.mrb[48].mxu1 %vm96_vm1, %v1975_v14  ;;  %v2051_v31 = vshrl.u32 %v1975_v14, 16 }
0x18f6   :  { %2510 = vmatpush3.bf16.msra.mxu1 %v2571_v20  ;;  %2513 = vmatprep.mubr.msk.bf16.mxu1 %vm2663_vm0, %v3046_v9 }
0x18f7   :  { %2511 = vmatprep.subr.bf16.mxu1 %v3046_v9  ;;  %v2050_v9 = vld [vmem:[%s2049_s23] sm:$0x1] }
0x18fa   :  { %2512 = vmatpush3.bf16.msra.mxu1 %v2572_v55 }
0x18fd   :  { %2514 = vmatmul.mubr.msk.bf16.vlgmr.msra.gmra.mrb[52].mxu1 %vm96_vm1, %v2051_v31 }
0x19c8   :  { %v2034_v33 = vpop.f32.mrb[48].mxu1 }
0x19c9   :  { %v2035_v34 = vadd.f32 %v2034_v33, %v1984_v32  ;;  %v2507_v35 = vpop.f32.mrb[49].mxu1 }
0x19ca   :  { %v2037_v2 = vpop.f32.mrb[50].mxu1 }
0x19cb   :  { %2040 = vst [vmem:[%s3298_s12] sm:$0x1] %v2035_v34  ;;  %v2508_v37 = vpop.f32.mrb[51].mxu1 }
0x19d0   :  { %v2102_v38 = vpop.f32.mrb[52].mxu1 }
0x19d1   :  { %v2103_v39 = vadd.f32 %v2102_v38, %v2050_v9  ;;  %v2515_v40 = vpop.f32.mrb[53].mxu1 }
0x19d2   :  { %v2105_v56 = vpop.f32.mrb[54].mxu1 }
0x19d3   :  { %2108 = vst [vmem:[%s3298_s12 + $0x1] sm:$0x1] %v2103_v39  ;;  %v2516_v41 = vpop.f32.mrb[55].mxu1 }

</bundles_post_ra>
